<compile_context>
chip_gen: v7x
topology: tpu7x:2x2x1
jax: 0.10.0
libtpu: 0.0.40
codegen_flags: <defaults>
</compile_context>

<pallas_src>
import functools

import jax
import jax.numpy as jnp
from jax.experimental import pallas as pl
from jax.experimental.pallas import tpu as pltpu

K = 3  # kernel size (fixed by the module defaults)


def conv_bn_relu_kernel(x_ref, w_ref, bias_ref, o_ref, xpad_ref, *, NB, H, W):
    """NB batch elements per grid step.

    x_ref:    (NB, H, W, Cin)       un-padded input tile          (VMEM)
    w_ref:    (K, K, Cout, Cin)     BN-scale-folded conv weights  (VMEM)
    bias_ref: (Cout, 1)             folded BN bias                (VMEM)
    o_ref:    (NB, Cout, H*W)       lane-dense output tile        (VMEM)
    xpad_ref: (NB, H+2, W+2, Cin)   VMEM scratch, zero-padded input
    """
    cin = x_ref.shape[-1]
    cout = o_ref.shape[1]
    HW = H * W
    M = NB * HW

    # In-kernel zero padding: borders zeroed, interior copied. This replaces
    # the wrapper-side jnp.pad (which doubled input HBM traffic).
    xpad_ref[...] = jnp.zeros_like(xpad_ref)
    xpad_ref[:, 1:H + 1, 1:W + 1, :] = x_ref[...]

    # 3x3 conv as 9 shifted matmuls, accumulated directly in the lane-dense
    # (Cout, M) orientation using the q @ k.T dot_general form (both operands
    # contract their last dim = Cin). Accumulator is (Cout, NB*H*W) f32.
    acc = jnp.zeros((cout, M), dtype=jnp.float32)
    for kh in range(K):
        for kw in range(K):
            patch = xpad_ref[:, kh:kh + H, kw:kw + W, :].reshape(M, cin)
            acc = acc + jax.lax.dot_general(
                w_ref[kh, kw],                      # (Cout, Cin)
                patch,                              # (M, Cin)
                dimension_numbers=(((1,), (1,)), ((), ())),
                preferred_element_type=jnp.float32)  # -> (Cout, M)

    y = jnp.maximum(acc + bias_ref[...], 0.0)       # folded BN bias + ReLU

    # Lane-dense stores: last dim is H*W (>= 128 here), columns are ordered
    # (nb, h, w) so a 128-aligned lane slice per batch element suffices.
    for nb in range(NB):                            # NB is small; static unroll
        o_ref[nb] = y[:, nb * HW:(nb + 1) * HW].astype(o_ref.dtype)


def conv_bn_relu(x_nchw, w_oihw, gamma, beta, running_mean, running_var,
                 eps=1e-5):
    """Conv2d(k=3, s=1, p=1, bias=False) + BatchNorm2d (eval) + ReLU.

    x_nchw: (N, Cin, H, W) float32, PyTorch layout.
    w_oihw: (Cout, Cin, 3, 3) float32, PyTorch layout.
    Returns (N, Cout, H, W) float32.
    """
    N, Cin, H, W = x_nchw.shape
    Cout = w_oihw.shape[0]

    # ---- glue (plain JAX): layout + BN folding ----
    # Channels-last input so Cin lands on the lane axis inside the kernel.
    x_nhwc = jnp.transpose(x_nchw, (0, 2, 3, 1)).astype(jnp.float32)

    # Fold the BN scale into the conv weights:  y = conv(x, w*s) + b.
    scale = gamma / jnp.sqrt(running_var + eps)          # (Cout,)
    bias = beta - running_mean * scale                   # (Cout,)
    w_folded = (w_oihw * scale[:, None, None, None]).astype(jnp.float32)
    # (Cout, Cin, kh, kw) -> (kh, kw, Cout, Cin): the kernel contracts the
    # trailing Cin of both operands and gets a lane-dense (Cout, M) result.
    w_kkoc = jnp.transpose(w_folded, (2, 3, 0, 1))       # (K, K, Cout, Cin)
    bias_col = bias.reshape(Cout, 1).astype(jnp.float32)

    # Batch fusion: enough images per grid step that the matmul free dim
    # (NB*H*W) reaches ~512, amortizing the ~0.35us/step pipeline overhead.
    target_m = 512
    nb_target = max(1, min(N, -(-target_m // (H * W))))
    NB = 1
    for cand in range(nb_target, 0, -1):
        if N % cand == 0:
            NB = cand
            break

    kernel = functools.partial(conv_bn_relu_kernel, NB=NB, H=H, W=W)

    out = pl.pallas_call(
        kernel,
        out_shape=jax.ShapeDtypeStruct((N, Cout, H * W), jnp.float32),
        grid_spec=pltpu.PrefetchScalarGridSpec(
            num_scalar_prefetch=0,
            grid=(N // NB,),
            in_specs=[
                pl.BlockSpec((NB, H, W, Cin), lambda n: (n, 0, 0, 0)),
                # Invariant operands: constant index maps, stay resident.
                pl.BlockSpec((K, K, Cout, Cin), lambda n: (0, 0, 0, 0)),
                pl.BlockSpec((Cout, 1), lambda n: (0, 0)),
            ],
            out_specs=pl.BlockSpec((NB, Cout, H * W), lambda n: (n, 0, 0)),
            scratch_shapes=[pltpu.VMEM((NB, H + 2, W + 2, Cin), jnp.float32)],
        ),
        compiler_params=pltpu.CompilerParams(
            dimension_semantics=("parallel",),
            vmem_limit_bytes=32 * 1024 * 1024),
    )(x_nhwc, w_kkoc, bias_col)

    # (N, Cout, H*W) is already NCHW order: pure reshape, no output transpose.
    return out.reshape(N, Cout, H, W)


def _reference(x_nchw, w_oihw, gamma, beta, mean, var, eps=1e-5):
    y = jax.lax.conv_general_dilated(
        x_nchw, w_oihw, window_strides=(1, 1), padding=((1, 1), (1, 1)),
        dimension_numbers=("NCHW", "OIHW", "NCHW"))
    scale = (gamma / jnp.sqrt(var + eps)).reshape(1, -1, 1, 1)
    bias = (beta - mean * gamma / jnp.sqrt(var + eps)).reshape(1, -1, 1, 1)
    return jnp.maximum(y * scale + bias, 0.0)


if __name__ == "__main__":
    key = jax.random.PRNGKey(0)
    kx, kw, kg, kb, km, kv = jax.random.split(key, 6)

    N, Cin, H, W = 2, 4, 16, 16
    Cout = 8

    x = jax.random.normal(kx, (N, Cin, H, W), dtype=jnp.float32)
    w = jax.random.normal(kw, (Cout, Cin, K, K), dtype=jnp.float32) * 0.1
    gamma = 1.0 + 0.1 * jax.random.normal(kg, (Cout,), dtype=jnp.float32)
    beta = 0.1 * jax.random.normal(kb, (Cout,), dtype=jnp.float32)
    running_mean = 0.1 * jax.random.normal(km, (Cout,), dtype=jnp.float32)
    running_var = jnp.abs(jax.random.normal(kv, (Cout,), dtype=jnp.float32)) + 0.5

    out = conv_bn_relu(x, w, gamma, beta, running_mean, running_var)
    out = jax.block_until_ready(out)

    ref = _reference(x, w, gamma, beta, running_mean, running_var)
    assert out.shape == (N, Cout, H, W)
    assert jnp.allclose(out, ref, atol=1e-3, rtol=1e-3), "mismatch vs reference"

    print("KERNEL_OK")
</pallas_src>

<mosaic_0001>
module attributes {stable_mosaic.version = 11 : i64} {
  func.func @conv_bn_relu_kernel(%arg0: i32, %arg1: memref<2x16x16x4xf32, #tpu.memory_space<vmem>>, %arg2: memref<3x3x8x4xf32, #tpu.memory_space<vmem>>, %arg3: memref<8x1xf32, #tpu.memory_space<vmem>>, %arg4: memref<2x8x256xf32, #tpu.memory_space<vmem>>, %arg5: memref<2x18x18x4xf32, #tpu.memory_space<vmem>>) attributes {dimension_semantics = [#tpu.dimension_semantics<parallel>], iteration_bounds = array<i64: 1>, scalar_prefetch = 0 : i64, scratch_operands = 1 : i64, tpu.core_type = #tpu.core_type<tc>, window_params = [{transform_indices = @transform_0, window_bounds = array<i64: 2, 16, 16, 4>}, {pipeline_mode = #tpu.pipeline_mode<synchronous>, transform_indices = @transform_1, window_bounds = array<i64: 3, 3, 8, 4>}, {pipeline_mode = #tpu.pipeline_mode<synchronous>, transform_indices = @transform_2, window_bounds = array<i64: 8, 1>}, {transform_indices = @transform_3, window_bounds = array<i64: 2, 8, 256>}]} {
    %cst = arith.constant 0.000000e+00 : f32
    %0 = vector.broadcast %cst : f32 to vector<2x18x18x4xf32>
    %c0 = arith.constant 0 : index
    %c0_0 = arith.constant 0 : index
    %c0_1 = arith.constant 0 : index
    %c0_2 = arith.constant 0 : index
    %1 = vector.load %arg5[%c0, %c0_0, %c0_1, %c0_2] : memref<2x18x18x4xf32, #tpu.memory_space<vmem>>, vector<2x18x18x4xf32>
    tpu.vector_store %arg5[%c0, %c0_0, %c0_1, %c0_2], %0 {strides = array<i32>} : memref<2x18x18x4xf32, #tpu.memory_space<vmem>>, vector<2x18x18x4xf32>,
    %c0_3 = arith.constant 0 : index
    %c0_4 = arith.constant 0 : index
    %c0_5 = arith.constant 0 : index
    %c0_6 = arith.constant 0 : index
    %2 = vector.load %arg1[%c0_3, %c0_4, %c0_5, %c0_6] : memref<2x16x16x4xf32, #tpu.memory_space<vmem>>, vector<2x16x16x4xf32>
    %c0_7 = arith.constant 0 : index
    %c1 = arith.constant 1 : index
    %c1_8 = arith.constant 1 : index
    %c0_9 = arith.constant 0 : index
    %3 = vector.load %arg5[%c0_7, %c1, %c1_8, %c0_9] : memref<2x18x18x4xf32, #tpu.memory_space<vmem>>, vector<2x16x16x4xf32>
    tpu.vector_store %arg5[%c0_7, %c1, %c1_8, %c0_9], %2 {strides = array<i32>} : memref<2x18x18x4xf32, #tpu.memory_space<vmem>>, vector<2x16x16x4xf32>,
    %cst_10 = arith.constant 0.000000e+00 : f32
    %4 = vector.broadcast %cst_10 : f32 to vector<8x512xf32>
    %c0_11 = arith.constant 0 : index
    %c0_12 = arith.constant 0 : index
    %c0_13 = arith.constant 0 : index
    %c0_14 = arith.constant 0 : index
    %5 = vector.load %arg5[%c0_11, %c0_12, %c0_13, %c0_14] : memref<2x18x18x4xf32, #tpu.memory_space<vmem>>, vector<2x16x16x4xf32>
    %6 = vector.shape_cast %5 : vector<2x16x16x4xf32> to vector<512x4xf32>
    %c0_15 = arith.constant 0 : index
    %c0_16 = arith.constant 0 : index
    %c0_17 = arith.constant 0 : index
    %c0_18 = arith.constant 0 : index
    %7 = vector.load %arg2[%c0_15, %c0_16, %c0_17, %c0_18] : memref<3x3x8x4xf32, #tpu.memory_space<vmem>>, vector<1x1x8x4xf32>
    %8 = vector.shape_cast %7 : vector<1x1x8x4xf32> to vector<8x4xf32>
    %cst_19 = arith.constant dense<0.000000e+00> : vector<8x512xf32>
    %9 = tpu.matmul %8, %6, %cst_19 {dimension_numbers = #tpu.dot_dimension_numbers<[1], [1], [0], [0], [0, 0, 1, 0], [], []>} : vector<8x4xf32>, vector<512x4xf32>, vector<8x512xf32> -> vector<8x512xf32>
    %10 = arith.addf %4, %9 : vector<8x512xf32>
    %c0_20 = arith.constant 0 : index
    %c0_21 = arith.constant 0 : index
    %c1_22 = arith.constant 1 : index
    %c0_23 = arith.constant 0 : index
    %11 = vector.load %arg5[%c0_20, %c0_21, %c1_22, %c0_23] : memref<2x18x18x4xf32, #tpu.memory_space<vmem>>, vector<2x16x16x4xf32>
    %12 = vector.shape_cast %11 : vector<2x16x16x4xf32> to vector<512x4xf32>
    %c0_24 = arith.constant 0 : index
    %c1_25 = arith.constant 1 : index
    %c0_26 = arith.constant 0 : index
    %c0_27 = arith.constant 0 : index
    %13 = vector.load %arg2[%c0_24, %c1_25, %c0_26, %c0_27] : memref<3x3x8x4xf32, #tpu.memory_space<vmem>>, vector<1x1x8x4xf32>
    %14 = vector.shape_cast %13 : vector<1x1x8x4xf32> to vector<8x4xf32>
    %cst_28 = arith.constant dense<0.000000e+00> : vector<8x512xf32>
    %15 = tpu.matmul %14, %12, %cst_28 {dimension_numbers = #tpu.dot_dimension_numbers<[1], [1], [0], [0], [0, 0, 1, 0], [], []>} : vector<8x4xf32>, vector<512x4xf32>, vector<8x512xf32> -> vector<8x512xf32>
    %16 = arith.addf %10, %15 : vector<8x512xf32>
    %c0_29 = arith.constant 0 : index
    %c0_30 = arith.constant 0 : index
    %c2 = arith.constant 2 : index
    %c0_31 = arith.constant 0 : index
    %17 = vector.load %arg5[%c0_29, %c0_30, %c2, %c0_31] : memref<2x18x18x4xf32, #tpu.memory_space<vmem>>, vector<2x16x16x4xf32>
    %18 = vector.shape_cast %17 : vector<2x16x16x4xf32> to vector<512x4xf32>
    %c0_32 = arith.constant 0 : index
    %c2_33 = arith.constant 2 : index
    %c0_34 = arith.constant 0 : index
    %c0_35 = arith.constant 0 : index
    %19 = vector.load %arg2[%c0_32, %c2_33, %c0_34, %c0_35] : memref<3x3x8x4xf32, #tpu.memory_space<vmem>>, vector<1x1x8x4xf32>
    %20 = vector.shape_cast %19 : vector<1x1x8x4xf32> to vector<8x4xf32>
    %cst_36 = arith.constant dense<0.000000e+00> : vector<8x512xf32>
    %21 = tpu.matmul %20, %18, %cst_36 {dimension_numbers = #tpu.dot_dimension_numbers<[1], [1], [0], [0], [0, 0, 1, 0], [], []>} : vector<8x4xf32>, vector<512x4xf32>, vector<8x512xf32> -> vector<8x512xf32>
    %22 = arith.addf %16, %21 : vector<8x512xf32>
    %c0_37 = arith.constant 0 : index
    %c1_38 = arith.constant 1 : index
    %c0_39 = arith.constant 0 : index
    %c0_40 = arith.constant 0 : index
    %23 = vector.load %arg5[%c0_37, %c1_38, %c0_39, %c0_40] : memref<2x18x18x4xf32, #tpu.memory_space<vmem>>, vector<2x16x16x4xf32>
    %24 = vector.shape_cast %23 : vector<2x16x16x4xf32> to vector<512x4xf32>
    %c1_41 = arith.constant 1 : index
    %c0_42 = arith.constant 0 : index
    %c0_43 = arith.constant 0 : index
    %c0_44 = arith.constant 0 : index
    %25 = vector.load %arg2[%c1_41, %c0_42, %c0_43, %c0_44] : memref<3x3x8x4xf32, #tpu.memory_space<vmem>>, vector<1x1x8x4xf32>
    %26 = vector.shape_cast %25 : vector<1x1x8x4xf32> to vector<8x4xf32>
    %cst_45 = arith.constant dense<0.000000e+00> : vector<8x512xf32>
    %27 = tpu.matmul %26, %24, %cst_45 {dimension_numbers = #tpu.dot_dimension_numbers<[1], [1], [0], [0], [0, 0, 1, 0], [], []>} : vector<8x4xf32>, vector<512x4xf32>, vector<8x512xf32> -> vector<8x512xf32>
    %28 = arith.addf %22, %27 : vector<8x512xf32>
    %c0_46 = arith.constant 0 : index
    %c1_47 = arith.constant 1 : index
    %c1_48 = arith.constant 1 : index
    %c0_49 = arith.constant 0 : index
    %29 = vector.load %arg5[%c0_46, %c1_47, %c1_48, %c0_49] : memref<2x18x18x4xf32, #tpu.memory_space<vmem>>, vector<2x16x16x4xf32>
    %30 = vector.shape_cast %29 : vector<2x16x16x4xf32> to vector<512x4xf32>
    %c1_50 = arith.constant 1 : index
    %c1_51 = arith.constant 1 : index
    %c0_52 = arith.constant 0 : index
    %c0_53 = arith.constant 0 : index
    %31 = vector.load %arg2[%c1_50, %c1_51, %c0_52, %c0_53] : memref<3x3x8x4xf32, #tpu.memory_space<vmem>>, vector<1x1x8x4xf32>
    %32 = vector.shape_cast %31 : vector<1x1x8x4xf32> to vector<8x4xf32>
    %cst_54 = arith.constant dense<0.000000e+00> : vector<8x512xf32>
    %33 = tpu.matmul %32, %30, %cst_54 {dimension_numbers = #tpu.dot_dimension_numbers<[1], [1], [0], [0], [0, 0, 1, 0], [], []>} : vector<8x4xf32>, vector<512x4xf32>, vector<8x512xf32> -> vector<8x512xf32>
    %34 = arith.addf %28, %33 : vector<8x512xf32>
    %c0_55 = arith.constant 0 : index
    %c1_56 = arith.constant 1 : index
    %c2_57 = arith.constant 2 : index
    %c0_58 = arith.constant 0 : index
    %35 = vector.load %arg5[%c0_55, %c1_56, %c2_57, %c0_58] : memref<2x18x18x4xf32, #tpu.memory_space<vmem>>, vector<2x16x16x4xf32>
    %36 = vector.shape_cast %35 : vector<2x16x16x4xf32> to vector<512x4xf32>
    %c1_59 = arith.constant 1 : index
    %c2_60 = arith.constant 2 : index
    %c0_61 = arith.constant 0 : index
    %c0_62 = arith.constant 0 : index
    %37 = vector.load %arg2[%c1_59, %c2_60, %c0_61, %c0_62] : memref<3x3x8x4xf32, #tpu.memory_space<vmem>>, vector<1x1x8x4xf32>
    %38 = vector.shape_cast %37 : vector<1x1x8x4xf32> to vector<8x4xf32>
    %cst_63 = arith.constant dense<0.000000e+00> : vector<8x512xf32>
    %39 = tpu.matmul %38, %36, %cst_63 {dimension_numbers = #tpu.dot_dimension_numbers<[1], [1], [0], [0], [0, 0, 1, 0], [], []>} : vector<8x4xf32>, vector<512x4xf32>, vector<8x512xf32> -> vector<8x512xf32>
    %40 = arith.addf %34, %39 : vector<8x512xf32>
    %c0_64 = arith.constant 0 : index
    %c2_65 = arith.constant 2 : index
    %c0_66 = arith.constant 0 : index
    %c0_67 = arith.constant 0 : index
    %41 = vector.load %arg5[%c0_64, %c2_65, %c0_66, %c0_67] : memref<2x18x18x4xf32, #tpu.memory_space<vmem>>, vector<2x16x16x4xf32>
    %42 = vector.shape_cast %41 : vector<2x16x16x4xf32> to vector<512x4xf32>
    %c2_68 = arith.constant 2 : index
    %c0_69 = arith.constant 0 : index
    %c0_70 = arith.constant 0 : index
    %c0_71 = arith.constant 0 : index
    %43 = vector.load %arg2[%c2_68, %c0_69, %c0_70, %c0_71] : memref<3x3x8x4xf32, #tpu.memory_space<vmem>>, vector<1x1x8x4xf32>
    %44 = vector.shape_cast %43 : vector<1x1x8x4xf32> to vector<8x4xf32>
    %cst_72 = arith.constant dense<0.000000e+00> : vector<8x512xf32>
    %45 = tpu.matmul %44, %42, %cst_72 {dimension_numbers = #tpu.dot_dimension_numbers<[1], [1], [0], [0], [0, 0, 1, 0], [], []>} : vector<8x4xf32>, vector<512x4xf32>, vector<8x512xf32> -> vector<8x512xf32>
    %46 = arith.addf %40, %45 : vector<8x512xf32>
    %c0_73 = arith.constant 0 : index
    %c2_74 = arith.constant 2 : index
    %c1_75 = arith.constant 1 : index
    %c0_76 = arith.constant 0 : index
    %47 = vector.load %arg5[%c0_73, %c2_74, %c1_75, %c0_76] : memref<2x18x18x4xf32, #tpu.memory_space<vmem>>, vector<2x16x16x4xf32>
    %48 = vector.shape_cast %47 : vector<2x16x16x4xf32> to vector<512x4xf32>
    %c2_77 = arith.constant 2 : index
    %c1_78 = arith.constant 1 : index
    %c0_79 = arith.constant 0 : index
    %c0_80 = arith.constant 0 : index
    %49 = vector.load %arg2[%c2_77, %c1_78, %c0_79, %c0_80] : memref<3x3x8x4xf32, #tpu.memory_space<vmem>>, vector<1x1x8x4xf32>
    %50 = vector.shape_cast %49 : vector<1x1x8x4xf32> to vector<8x4xf32>
    %cst_81 = arith.constant dense<0.000000e+00> : vector<8x512xf32>
    %51 = tpu.matmul %50, %48, %cst_81 {dimension_numbers = #tpu.dot_dimension_numbers<[1], [1], [0], [0], [0, 0, 1, 0], [], []>} : vector<8x4xf32>, vector<512x4xf32>, vector<8x512xf32> -> vector<8x512xf32>
    %52 = arith.addf %46, %51 : vector<8x512xf32>
    %c0_82 = arith.constant 0 : index
    %c2_83 = arith.constant 2 : index
    %c2_84 = arith.constant 2 : index
    %c0_85 = arith.constant 0 : index
    %53 = vector.load %arg5[%c0_82, %c2_83, %c2_84, %c0_85] : memref<2x18x18x4xf32, #tpu.memory_space<vmem>>, vector<2x16x16x4xf32>
    %54 = vector.shape_cast %53 : vector<2x16x16x4xf32> to vector<512x4xf32>
    %c2_86 = arith.constant 2 : index
    %c2_87 = arith.constant 2 : index
    %c0_88 = arith.constant 0 : index
    %c0_89 = arith.constant 0 : index
    %55 = vector.load %arg2[%c2_86, %c2_87, %c0_88, %c0_89] : memref<3x3x8x4xf32, #tpu.memory_space<vmem>>, vector<1x1x8x4xf32>
    %56 = vector.shape_cast %55 : vector<1x1x8x4xf32> to vector<8x4xf32>
    %cst_90 = arith.constant dense<0.000000e+00> : vector<8x512xf32>
    %57 = tpu.matmul %56, %54, %cst_90 {dimension_numbers = #tpu.dot_dimension_numbers<[1], [1], [0], [0], [0, 0, 1, 0], [], []>} : vector<8x4xf32>, vector<512x4xf32>, vector<8x512xf32> -> vector<8x512xf32>
    %58 = arith.addf %52, %57 : vector<8x512xf32>
    %c0_91 = arith.constant 0 : index
    %c0_92 = arith.constant 0 : index
    %59 = vector.load %arg3[%c0_91, %c0_92] : memref<8x1xf32, #tpu.memory_space<vmem>>, vector<8x1xf32>
    %60 = vector.broadcast %59 : vector<8x1xf32> to vector<8x512xf32>
    %61 = arith.addf %58, %60 : vector<8x512xf32>
    %cst_93 = arith.constant 0.000000e+00 : f32
    %62 = vector.broadcast %cst_93 : f32 to vector<8x512xf32>
    %63 = arith.maximumf %61, %62 : vector<8x512xf32>
    %64 = vector.extract_strided_slice %63 {offsets = [0, 0], sizes = [8, 256], strides = [1, 1]} : vector<8x512xf32> to vector<8x256xf32>
    %c0_94 = arith.constant 0 : index
    %c0_95 = arith.constant 0 : index
    %c0_96 = arith.constant 0 : index
    %65 = vector.load %arg4[%c0_94, %c0_95, %c0_96] : memref<2x8x256xf32, #tpu.memory_space<vmem>>, vector<1x8x256xf32>
    %66 = vector.shape_cast %65 : vector<1x8x256xf32> to vector<8x256xf32>
    %67 = vector.shape_cast %64 : vector<8x256xf32> to vector<1x8x256xf32>
    tpu.vector_store %arg4[%c0_94, %c0_95, %c0_96], %67 {strides = array<i32>} : memref<2x8x256xf32, #tpu.memory_space<vmem>>, vector<1x8x256xf32>,
    %68 = vector.extract_strided_slice %63 {offsets = [0, 256], sizes = [8, 256], strides = [1, 1]} : vector<8x512xf32> to vector<8x256xf32>
    %c1_97 = arith.constant 1 : index
    %c0_98 = arith.constant 0 : index
    %c0_99 = arith.constant 0 : index
    %69 = vector.load %arg4[%c1_97, %c0_98, %c0_99] : memref<2x8x256xf32, #tpu.memory_space<vmem>>, vector<1x8x256xf32>
    %70 = vector.shape_cast %69 : vector<1x8x256xf32> to vector<8x256xf32>
    %71 = vector.shape_cast %68 : vector<8x256xf32> to vector<1x8x256xf32>
    tpu.vector_store %arg4[%c1_97, %c0_98, %c0_99], %71 {strides = array<i32>} : memref<2x8x256xf32, #tpu.memory_space<vmem>>, vector<1x8x256xf32>,
    return
  }
  func.func @transform_0(%arg0: i32) -> (i32, i32, i32, i32) {
    %c0_i32 = arith.constant 0 : i32
    %c0_i32_0 = arith.constant 0 : i32
    %c0_i32_1 = arith.constant 0 : i32
    %c0_i32_2 = arith.constant 0 : i32
    return %arg0, %c0_i32, %c0_i32_0, %c0_i32_1 : i32, i32, i32, i32
  }
  func.func @transform_1(%arg0: i32) -> (i32, i32, i32, i32) {
    %c0_i32 = arith.constant 0 : i32
    %c0_i32_0 = arith.constant 0 : i32
    %c0_i32_1 = arith.constant 0 : i32
    %c0_i32_2 = arith.constant 0 : i32
    %c0_i32_3 = arith.constant 0 : i32
    return %c0_i32, %c0_i32_0, %c0_i32_1, %c0_i32_2 : i32, i32, i32, i32
  }
  func.func @transform_2(%arg0: i32) -> (i32, i32) {
    %c0_i32 = arith.constant 0 : i32
    %c0_i32_0 = arith.constant 0 : i32
    %c0_i32_1 = arith.constant 0 : i32
    return %c0_i32, %c0_i32_0 : i32, i32
  }
  func.func @transform_3(%arg0: i32) -> (i32, i32, i32) {
    %c0_i32 = arith.constant 0 : i32
    %c0_i32_0 = arith.constant 0 : i32
    %c0_i32_1 = arith.constant 0 : i32
    return %arg0, %c0_i32, %c0_i32_0 : i32, i32, i32
  }
}

</mosaic_0001>

<bundles_post_ra>
// kernel: tpu_custom_call.1
= control target key start
LH: loop header
LB: loop body
LE: loop exit
PB: predicated region body
PF: predicated region fallthrough
CT: control target
= control target key end

     0   :  { %vm15_vm0 = vcmask 31744   ;;  %vm18_vm1 = vcmask 25600   ;;  %v6084_v3 = vmov 0.0   ;;  %s7666_s0 = inlined_call_operand.vmem [shape: f32[2,16,16,4], index: 0, kind: input, shape index: {}]   ;;  %s7667_s1 = inlined_call_operand.vmem [shape: f32[3,3,8,4], index: 1, kind: input, shape index: {}]   ;;  %s7668_s2 = inlined_call_operand.vmem [shape: f32[8,1], index: 2, kind: input, shape index: {}]   ;;  %s7669_s3 = inlined_call_operand.hbm [shape: f32[2,8,256], index: 3, kind: output, shape index: {}]  }
   0x1   :  { %v6112_v0 = vld [vmem:[%s7666_s0 + $0x70] sm:$0xff]  ;;  %v6117_v1 = vld [vmem:[%s7666_s0 + $0x78] sm:$0xff]  ;;  %41 = vst.msk [vmem:[#allocation2 + $0xc0] sm:$0xff] %vm15_vm0, %v6084_v3  ;;  %42 = vst.msk [vmem:[#allocation2 + $0xc8] sm:$0xff] %vm15_vm0, %v6084_v3 }
   0x2   :  { %v6122_v2 = vld [vmem:[%s7666_s0 + $0x170] sm:$0xff]  ;;  %43 = vst.msk [vmem:[#allocation2 + $0xd0] sm:$0x3] %vm18_vm1, %v6084_v3  ;;  %vm6132_vm2 = vmpackc.low %vm15_vm0, %vm15_vm0  ;;  %v172_v5 = vld [vmem:[%s7666_s0 + $0x178] sm:$0xff] }
   0x3   :  { %16 = vst.msk [vmem:[#allocation2] sm:$0xff] %vm15_vm0, %v6084_v3  ;;  %17 = vst.msk [vmem:[#allocation2 + $0x8] sm:$0xff] %vm15_vm0, %v6084_v3  ;;  %v141_v6 = vld [vmem:[%s7666_s0 + $0x80] sm:$0xff]  ;;  %v142_v7 = vld [vmem:[%s7666_s0 + $0x88] sm:$0xff] }
   0x4   :  { %19 = vst.msk [vmem:[#allocation2 + $0x10] sm:$0x3] %vm18_vm1, %v6084_v3  ;;  %22 = vst.msk [vmem:[#allocation2 + $0x28] sm:$0x3] %vm18_vm1, %v6084_v3  ;;  %v173_v8 = vld [vmem:[%s7666_s0 + $0x180] sm:$0xff]  ;;  %v174_v9 = vld [vmem:[%s7666_s0 + $0x188] sm:$0xff] }
   0x5   :  { %20 = vst.msk [vmem:[#allocation2 + $0x18] sm:$0xff] %vm15_vm0, %v6084_v3  ;;  %21 = vst.msk [vmem:[#allocation2 + $0x20] sm:$0xff] %vm15_vm0, %v6084_v3  ;;  %v125_v10 = vld [vmem:[%s7666_s0] sm:$0xff]  ;;  %v126_v11 = vld [vmem:[%s7666_s0 + $0x8] sm:$0xff] }
   0x6   :  { %23 = vst.msk [vmem:[#allocation2 + $0x30] sm:$0xff] %vm15_vm0, %v6084_v3  ;;  %24 = vst.msk [vmem:[#allocation2 + $0x38] sm:$0xff] %vm15_vm0, %v6084_v3  ;;  %v157_v12 = vld [vmem:[%s7666_s0 + $0x100] sm:$0xff]  ;;  %v158_v13 = vld [vmem:[%s7666_s0 + $0x108] sm:$0xff] }
   0x7   :  { %25 = vst.msk [vmem:[#allocation2 + $0x40] sm:$0x3] %vm18_vm1, %v6084_v3  ;;  %28 = vst.msk [vmem:[#allocation2 + $0x58] sm:$0x3] %vm18_vm1, %v6084_v3  ;;  %v143_v14 = vld [vmem:[%s7666_s0 + $0x90] sm:$0xff]  ;;  %v144_v15 = vld [vmem:[%s7666_s0 + $0x98] sm:$0xff] }
   0x8   :  { %26 = vst.msk [vmem:[#allocation2 + $0x48] sm:$0xff] %vm15_vm0, %v6084_v3  ;;  %27 = vst.msk [vmem:[#allocation2 + $0x50] sm:$0xff] %vm15_vm0, %v6084_v3  ;;  %v175_v16 = vld [vmem:[%s7666_s0 + $0x190] sm:$0xff]  ;;  %v176_v17 = vld [vmem:[%s7666_s0 + $0x198] sm:$0xff] }
   0x9   :  { %29 = vst.msk [vmem:[#allocation2 + $0x60] sm:$0xff] %vm15_vm0, %v6084_v3  ;;  %30 = vst.msk [vmem:[#allocation2 + $0x68] sm:$0xff] %vm15_vm0, %v6084_v3  ;;  %v127_v18 = vld [vmem:[%s7666_s0 + $0x10] sm:$0xff]  ;;  %v128_v19 = vld [vmem:[%s7666_s0 + $0x18] sm:$0xff] }
   0xa   :  { %31 = vst.msk [vmem:[#allocation2 + $0x70] sm:$0x3] %vm18_vm1, %v6084_v3  ;;  %34 = vst.msk [vmem:[#allocation2 + $0x88] sm:$0x3] %vm18_vm1, %v6084_v3  ;;  %v159_v20 = vld [vmem:[%s7666_s0 + $0x110] sm:$0xff]  ;;  %v160_v21 = vld [vmem:[%s7666_s0 + $0x118] sm:$0xff] }
   0xb   :  { %32 = vst.msk [vmem:[#allocation2 + $0x78] sm:$0xff] %vm15_vm0, %v6084_v3  ;;  %33 = vst.msk [vmem:[#allocation2 + $0x80] sm:$0xff] %vm15_vm0, %v6084_v3  ;;  %v145_v22 = vld [vmem:[%s7666_s0 + $0xa0] sm:$0xff]  ;;  %v146_v23 = vld [vmem:[%s7666_s0 + $0xa8] sm:$0xff] }
   0xc   :  { %35 = vst.msk [vmem:[#allocation2 + $0x90] sm:$0xff] %vm15_vm0, %v6084_v3  ;;  %36 = vst.msk [vmem:[#allocation2 + $0x98] sm:$0xff] %vm15_vm0, %v6084_v3  ;;  %v177_v24 = vld [vmem:[%s7666_s0 + $0x1a0] sm:$0xff]  ;;  %v320_v26 = vld [vmem:[#allocation2 + $0x9] sm:$0xff] }
   0xd   :  { %37 = vst.msk [vmem:[#allocation2 + $0xa0] sm:$0x3] %vm18_vm1, %v6084_v3  ;;  %40 = vst.msk [vmem:[#allocation2 + $0xb8] sm:$0x3] %vm18_vm1, %v6084_v3  ;;  %v319_v25 = vld [vmem:[#allocation2 + $0x1] sm:$0xff]  ;;  %v147_v59 = vld [vmem:[%s7666_s0 + $0xb0] sm:$0xff] }
   0xe   :  { %38 = vst.msk [vmem:[#allocation2 + $0xa8] sm:$0xff] %vm15_vm0, %v6084_v3  ;;  %39 = vst.msk [vmem:[#allocation2 + $0xb0] sm:$0xff] %vm15_vm0, %v6084_v3  ;;  %v5161_v31 = vpack.c.bf16 %v320_v26, %v319_v25  ;;  %v178_v51 = vld [vmem:[%s7666_s0 + $0x1a8] sm:$0xff]  ;;  %v129_v53 = vld [vmem:[%s7666_s0 + $0x20] sm:$0xff] }
   0xf   :  { %44 = vst.msk [vmem:[#allocation2 + $0xd8] sm:$0xff] %vm15_vm0, %v6084_v3  ;;  %45 = vst.msk [vmem:[#allocation2 + $0xe0] sm:$0xff] %vm15_vm0, %v6084_v3  ;;  %v130_v54 = vld [vmem:[%s7666_s0 + $0x28] sm:$0xff]  ;;  %v161_v57 = vld [vmem:[%s7666_s0 + $0x120] sm:$0xff] }
  0x10   :  { %46 = vst.msk [vmem:[#allocation2 + $0xe8] sm:$0x3] %vm18_vm1, %v6084_v3  ;;  %49 = vst.msk [vmem:[#allocation2 + $0x100] sm:$0x3] %vm18_vm1, %v6084_v3  ;;  %v162_v58 = vld [vmem:[%s7666_s0 + $0x128] sm:$0xff]  ;;  %v148_v61 = vld [vmem:[%s7666_s0 + $0xb8] sm:$0xff] }
  0x11   :  { %47 = vst.msk [vmem:[#allocation2 + $0xf0] sm:$0xff] %vm15_vm0, %v6084_v3  ;;  %48 = vst.msk [vmem:[#allocation2 + $0xf8] sm:$0xff] %vm15_vm0, %v6084_v3  ;;  %v179_v62 = vld [vmem:[%s7666_s0 + $0x1b0] sm:$0xff]  ;;  %v180_v63 = vld [vmem:[%s7666_s0 + $0x1b8] sm:$0xff] }
  0x12   :  { %50 = vst.msk [vmem:[#allocation2 + $0x108] sm:$0xff] %vm15_vm0, %v6084_v3  ;;  %51 = vst.msk [vmem:[#allocation2 + $0x110] sm:$0xff] %vm15_vm0, %v6084_v3 }
  0x13   :  { %52 = vst.msk [vmem:[#allocation2 + $0x118] sm:$0x3] %vm18_vm1, %v6084_v3  ;;  %55 = vst.msk [vmem:[#allocation2 + $0x130] sm:$0x3] %vm18_vm1, %v6084_v3 }
  0x14   :  { %53 = vst.msk [vmem:[#allocation2 + $0x120] sm:$0xff] %vm15_vm0, %v6084_v3  ;;  %54 = vst.msk [vmem:[#allocation2 + $0x128] sm:$0xff] %vm15_vm0, %v6084_v3 }
  0x15   :  { %56 = vst.msk [vmem:[#allocation2 + $0x138] sm:$0xff] %vm15_vm0, %v6084_v3  ;;  %57 = vst.msk [vmem:[#allocation2 + $0x140] sm:$0xff] %vm15_vm0, %v6084_v3 }
  0x16   :  { %58 = vst.msk [vmem:[#allocation2 + $0x148] sm:$0x3] %vm18_vm1, %v6084_v3  ;;  %61 = vst.msk [vmem:[#allocation2 + $0x160] sm:$0x3] %vm18_vm1, %v6084_v3 }
  0x17   :  { %59 = vst.msk [vmem:[#allocation2 + $0x150] sm:$0xff] %vm15_vm0, %v6084_v3  ;;  %60 = vst.msk [vmem:[#allocation2 + $0x158] sm:$0xff] %vm15_vm0, %v6084_v3 }
  0x18   :  { %62 = vst.msk [vmem:[#allocation2 + $0x168] sm:$0xff] %vm15_vm0, %v6084_v3  ;;  %63 = vst.msk [vmem:[#allocation2 + $0x170] sm:$0xff] %vm15_vm0, %v6084_v3 }
  0x19   :  { %64 = vst.msk [vmem:[#allocation2 + $0x178] sm:$0x3] %vm18_vm1, %v6084_v3  ;;  %67 = vst.msk [vmem:[#allocation2 + $0x190] sm:$0x3] %vm18_vm1, %v6084_v3 }
  0x1a   :  { %65 = vst.msk [vmem:[#allocation2 + $0x180] sm:$0xff] %vm15_vm0, %v6084_v3  ;;  %66 = vst.msk [vmem:[#allocation2 + $0x188] sm:$0xff] %vm15_vm0, %v6084_v3 }
  0x1b   :  { %68 = vst.msk [vmem:[#allocation2 + $0x198] sm:$0xff] %vm15_vm0, %v6084_v3  ;;  %69 = vst.msk [vmem:[#allocation2 + $0x1a0] sm:$0xff] %vm15_vm0, %v6084_v3 }
  0x1c   :  { %70 = vst.msk [vmem:[#allocation2 + $0x1a8] sm:$0x3] %vm18_vm1, %v6084_v3  ;;  %73 = vst.msk [vmem:[#allocation2 + $0x1c0] sm:$0x3] %vm18_vm1, %v6084_v3 }
  0x1d   :  { %71 = vst.msk [vmem:[#allocation2 + $0x1b0] sm:$0xff] %vm15_vm0, %v6084_v3  ;;  %72 = vst.msk [vmem:[#allocation2 + $0x1b8] sm:$0xff] %vm15_vm0, %v6084_v3 }
  0x1e   :  { %74 = vst.msk [vmem:[#allocation2 + $0x1c8] sm:$0xff] %vm15_vm0, %v6084_v3  ;;  %75 = vst.msk [vmem:[#allocation2 + $0x1d0] sm:$0xff] %vm15_vm0, %v6084_v3 }
  0x1f   :  { %76 = vst.msk [vmem:[#allocation2 + $0x1d8] sm:$0x3] %vm18_vm1, %v6084_v3  ;;  %79 = vst.msk [vmem:[#allocation2 + $0x1f0] sm:$0x3] %vm18_vm1, %v6084_v3 }
  0x20   :  { %77 = vst.msk [vmem:[#allocation2 + $0x1e0] sm:$0xff] %vm15_vm0, %v6084_v3  ;;  %78 = vst.msk [vmem:[#allocation2 + $0x1e8] sm:$0xff] %vm15_vm0, %v6084_v3 }
  0x21   :  { %80 = vst.msk [vmem:[#allocation2 + $0x1f8] sm:$0xff] %vm15_vm0, %v6084_v3  ;;  %81 = vst.msk [vmem:[#allocation2 + $0x200] sm:$0xff] %vm15_vm0, %v6084_v3 }
  0x22   :  { %82 = vst.msk [vmem:[#allocation2 + $0x208] sm:$0x3] %vm18_vm1, %v6084_v3  ;;  %85 = vst.msk [vmem:[#allocation2 + $0x220] sm:$0x3] %vm18_vm1, %v6084_v3 }
  0x23   :  { %83 = vst.msk [vmem:[#allocation2 + $0x210] sm:$0xff] %vm15_vm0, %v6084_v3  ;;  %84 = vst.msk [vmem:[#allocation2 + $0x218] sm:$0xff] %vm15_vm0, %v6084_v3 }
  0x24   :  { %86 = vst.msk [vmem:[#allocation2 + $0x228] sm:$0xff] %vm15_vm0, %v6084_v3  ;;  %87 = vst.msk [vmem:[#allocation2 + $0x230] sm:$0xff] %vm15_vm0, %v6084_v3  ;;  %v351_v27 = vld [vmem:[#allocation2 + $0x1b1] sm:$0xff]  ;;  %v352_v34 = vld [vmem:[#allocation2 + $0x1b9] sm:$0xff] }
  0x25   :  { %88 = vst.msk [vmem:[#allocation2 + $0x238] sm:$0x3] %vm18_vm1, %v6084_v3  ;;  %91 = vst.msk [vmem:[#allocation2 + $0x250] sm:$0x3] %vm18_vm1, %v6084_v3  ;;  %v5209_v37 = vpack.c.bf16 %v352_v34, %v351_v27 }
  0x26   :  { %89 = vst.msk [vmem:[#allocation2 + $0x240] sm:$0xff] %vm15_vm0, %v6084_v3  ;;  %90 = vst.msk [vmem:[#allocation2 + $0x248] sm:$0xff] %vm15_vm0, %v6084_v3 }
  0x27   :  { %92 = vst.msk [vmem:[#allocation2 + $0x258] sm:$0xff] %vm15_vm0, %v6084_v3  ;;  %93 = vst.msk [vmem:[#allocation2 + $0x260] sm:$0xff] %vm15_vm0, %v6084_v3 }
  0x28   :  { %94 = vst.msk [vmem:[#allocation2 + $0x268] sm:$0x3] %vm18_vm1, %v6084_v3  ;;  %97 = vst.msk [vmem:[#allocation2 + $0x280] sm:$0x3] %vm18_vm1, %v6084_v3 }
  0x29   :  { %95 = vst.msk [vmem:[#allocation2 + $0x270] sm:$0xff] %vm15_vm0, %v6084_v3  ;;  %96 = vst.msk [vmem:[#allocation2 + $0x278] sm:$0xff] %vm15_vm0, %v6084_v3 }
  0x2a   :  { %98 = vst.msk [vmem:[#allocation2 + $0x288] sm:$0xff] %vm15_vm0, %v6084_v3  ;;  %99 = vst.msk [vmem:[#allocation2 + $0x290] sm:$0xff] %vm15_vm0, %v6084_v3 }
  0x2b   :  { %100 = vst.msk [vmem:[#allocation2 + $0x298] sm:$0x3] %vm18_vm1, %v6084_v3  ;;  %103 = vst.msk [vmem:[#allocation2 + $0x2b0] sm:$0x3] %vm18_vm1, %v6084_v3 }
  0x2c   :  { %101 = vst.msk [vmem:[#allocation2 + $0x2a0] sm:$0xff] %vm15_vm0, %v6084_v3  ;;  %102 = vst.msk [vmem:[#allocation2 + $0x2a8] sm:$0xff] %vm15_vm0, %v6084_v3 }
  0x2d   :  { %104 = vst.msk [vmem:[#allocation2 + $0x2b8] sm:$0xff] %vm15_vm0, %v6084_v3  ;;  %105 = vst.msk [vmem:[#allocation2 + $0x2c0] sm:$0xff] %vm15_vm0, %v6084_v3 }
  0x2e   :  { %106 = vst.msk [vmem:[#allocation2 + $0x2c8] sm:$0x3] %vm18_vm1, %v6084_v3  ;;  %109 = vst.msk [vmem:[#allocation2 + $0x2e0] sm:$0x3] %vm18_vm1, %v6084_v3 }
  0x2f   :  { %107 = vst.msk [vmem:[#allocation2 + $0x2d0] sm:$0xff] %vm15_vm0, %v6084_v3  ;;  %108 = vst.msk [vmem:[#allocation2 + $0x2d8] sm:$0xff] %vm15_vm0, %v6084_v3 }
  0x30   :  { %110 = vst.msk [vmem:[#allocation2 + $0x2e8] sm:$0xff] %vm15_vm0, %v6084_v3  ;;  %111 = vst.msk [vmem:[#allocation2 + $0x2f0] sm:$0xff] %vm15_vm0, %v6084_v3 }
  0x31   :  { %112 = vst.msk [vmem:[#allocation2 + $0x2f8] sm:$0x3] %vm18_vm1, %v6084_v3  ;;  %115 = vst.msk [vmem:[#allocation2 + $0x310] sm:$0x3] %vm18_vm1, %v6084_v3 }
  0x32   :  { %113 = vst.msk [vmem:[#allocation2 + $0x300] sm:$0xff] %vm15_vm0, %v6084_v3  ;;  %114 = vst.msk [vmem:[#allocation2 + $0x308] sm:$0xff] %vm15_vm0, %v6084_v3 }
  0x33   :  { %116 = vst.msk [vmem:[#allocation2 + $0x318] sm:$0xff] %vm15_vm0, %v6084_v3  ;;  %117 = vst.msk [vmem:[#allocation2 + $0x320] sm:$0xff] %vm15_vm0, %v6084_v3 }
  0x34   :  { %118 = vst.msk [vmem:[#allocation2 + $0x328] sm:$0x3] %vm18_vm1, %v6084_v3  ;;  %121 = vst.msk [vmem:[#allocation2 + $0x340] sm:$0x3] %vm18_vm1, %v6084_v3 }
  0x35   :  { %119 = vst.msk [vmem:[#allocation2 + $0x330] sm:$0xff] %vm15_vm0, %v6084_v3  ;;  %120 = vst.msk [vmem:[#allocation2 + $0x338] sm:$0xff] %vm15_vm0, %v6084_v3 }
  0x36   :  { %122 = vst.msk [vmem:[#allocation2 + $0x348] sm:$0xff] %vm15_vm0, %v6084_v3  ;;  %123 = vst.msk [vmem:[#allocation2 + $0x350] sm:$0xff] %vm15_vm0, %v6084_v3 }
  0x37   :  { %124 = vst.msk [vmem:[#allocation2 + $0x358] sm:$0x3] %vm18_vm1, %v6084_v3  ;;  %v132_v3 = vld [vmem:[%s7666_s0 + $0x38] sm:$0xff] }
  0x38   :  { %204 = vst.msk [vmem:[#allocation2 + $0xc1] sm:$0xff] %vm15_vm0, %v6112_v0  ;;  %205 = vst.msk [vmem:[#allocation2 + $0xc9] sm:$0xff] %vm15_vm0, %v6117_v1 }
  0x39   :  { %236 = vst.msk [vmem:[#allocation2 + $0x271] sm:$0xff] %vm15_vm0, %v6122_v2  ;;  %237 = vst.msk [vmem:[#allocation2 + $0x279] sm:$0xff] %vm15_vm0, %v172_v5  ;;  %v131_v2 = vld [vmem:[%s7666_s0 + $0x30] sm:$0xff] }
  0x3a   :  { %206 = vst.msk [vmem:[#allocation2 + $0xd9] sm:$0xff] %vm15_vm0, %v141_v6  ;;  %207 = vst.msk [vmem:[#allocation2 + $0xe1] sm:$0xff] %vm15_vm0, %v142_v7  ;;  %v163_v5 = vld [vmem:[%s7666_s0 + $0x130] sm:$0xff] }
  0x3b   :  { %238 = vst.msk [vmem:[#allocation2 + $0x289] sm:$0xff] %vm15_vm0, %v173_v8  ;;  %239 = vst.msk [vmem:[#allocation2 + $0x291] sm:$0xff] %vm15_vm0, %v174_v9 }
  0x3c   :  { %190 = vst.msk [vmem:[#allocation2 + $0x19] sm:$0xff] %vm15_vm0, %v125_v10  ;;  %191 = vst.msk [vmem:[#allocation2 + $0x21] sm:$0xff] %vm15_vm0, %v126_v11  ;;  %v164_v10 = vld [vmem:[%s7666_s0 + $0x138] sm:$0xff]  ;;  %v149_v11 = vld [vmem:[%s7666_s0 + $0xc0] sm:$0xff] }
  0x3d   :  { %222 = vst.msk [vmem:[#allocation2 + $0x1c9] sm:$0xff] %vm15_vm0, %v157_v12  ;;  %223 = vst.msk [vmem:[#allocation2 + $0x1d1] sm:$0xff] %vm15_vm0, %v158_v13  ;;  %v150_v12 = vld [vmem:[%s7666_s0 + $0xc8] sm:$0xff] }
  0x3e   :  { %208 = vst.msk [vmem:[#allocation2 + $0xf1] sm:$0xff] %vm15_vm0, %v143_v14  ;;  %209 = vst.msk [vmem:[#allocation2 + $0xf9] sm:$0xff] %vm15_vm0, %v144_v15  ;;  %v181_v14 = vld [vmem:[%s7666_s0 + $0x1c0] sm:$0xff]  ;;  %v182_v15 = vld [vmem:[%s7666_s0 + $0x1c8] sm:$0xff] }
  0x3f   :  { %240 = vst.msk [vmem:[#allocation2 + $0x2a1] sm:$0xff] %vm15_vm0, %v175_v16  ;;  %241 = vst.msk [vmem:[#allocation2 + $0x2a9] sm:$0xff] %vm15_vm0, %v176_v17  ;;  %v335_v28 = vld [vmem:[#allocation2 + $0xc1] sm:$0xff]  ;;  %v336_v29 = vld [vmem:[#allocation2 + $0xc9] sm:$0xff] }
  0x40   :  { %192 = vst.msk [vmem:[#allocation2 + $0x31] sm:$0xff] %vm15_vm0, %v127_v18  ;;  %193 = vst.msk [vmem:[#allocation2 + $0x39] sm:$0xff] %vm15_vm0, %v128_v19  ;;  %v367_v30 = vld [vmem:[#allocation2 + $0x271] sm:$0xff]  ;;  %v5158_v32 = vpack.c.bf16 %v336_v29, %v335_v28  ;;  %v368_v33 = vld [vmem:[#allocation2 + $0x279] sm:$0xff] }
  0x41   :  { %224 = vst.msk [vmem:[#allocation2 + $0x1e1] sm:$0xff] %vm15_vm0, %v159_v20  ;;  %225 = vst.msk [vmem:[#allocation2 + $0x1e9] sm:$0xff] %vm15_vm0, %v160_v21  ;;  %v337_v35 = vld [vmem:[#allocation2 + $0xd9] sm:$0xff]  ;;  %v5206_v36 = vpack.c.bf16 %v368_v33, %v367_v30  ;;  %v338_v38 = vld [vmem:[#allocation2 + $0xe1] sm:$0xff] }
  0x42   :  { %210 = vst.msk [vmem:[#allocation2 + $0x109] sm:$0xff] %vm15_vm0, %v145_v22  ;;  %211 = vst.msk [vmem:[#allocation2 + $0x111] sm:$0xff] %vm15_vm0, %v146_v23  ;;  %v369_v39 = vld [vmem:[#allocation2 + $0x289] sm:$0xff]  ;;  %v370_v40 = vld [vmem:[#allocation2 + $0x291] sm:$0xff]  ;;  %5160 = vmatprep.subr.msk.bf16.mxu0 %vm6132_vm2, %v5158_v32  ;;  %v5164_v41 = vpack.c.bf16 %v338_v38, %v337_v35 }
  0x43   :  { %242 = vst.msk [vmem:[#allocation2 + $0x2b9] sm:$0xff] %vm15_vm0, %v177_v24  ;;  %v5212_v42 = vpack.c.bf16 %v370_v40, %v369_v39  ;;  %5208 = vmatprep.subr.msk.bf16.mxu1 %vm6132_vm2, %v5206_v36  ;;  %5163 = vmatpush3.bf16.xpose.msk.msra.mxu0 %vm6132_vm2, %v5161_v31  ;;  %v321_v43 = vld [vmem:[#allocation2 + $0x19] sm:$0xff]  ;;  %v322_v44 = vld [vmem:[#allocation2 + $0x21] sm:$0xff]  ;;  %243 = vst.msk [vmem:[#allocation2 + $0x2c1] sm:$0xff] %vm15_vm0, %v178_v51 }
  0x44   :  { %5211 = vmatpush3.bf16.xpose.msk.msra.mxu1 %vm6132_vm2, %v5209_v37  ;;  %5166 = vmatprep.subr.msk.bf16.mxu0 %vm6132_vm2, %v5164_v41  ;;  %v353_v45 = vld [vmem:[#allocation2 + $0x1c9] sm:$0xff]  ;;  %v354_v46 = vld [vmem:[#allocation2 + $0x1d1] sm:$0xff]  ;;  %v5167_v52 = vpack.c.bf16 %v322_v44, %v321_v43  ;;  %194 = vst.msk [vmem:[#allocation2 + $0x49] sm:$0xff] %vm15_vm0, %v129_v53  ;;  %195 = vst.msk [vmem:[#allocation2 + $0x51] sm:$0xff] %vm15_vm0, %v130_v54 }
  0x45   :  { %5214 = vmatprep.subr.msk.bf16.mxu1 %vm6132_vm2, %v5212_v42  ;;  %v339_v47 = vld [vmem:[#allocation2 + $0xf1] sm:$0xff]  ;;  %v340_v48 = vld [vmem:[#allocation2 + $0xf9] sm:$0xff]  ;;  %v5215_v55 = vpack.c.bf16 %v354_v46, %v353_v45  ;;  %226 = vst.msk [vmem:[#allocation2 + $0x1f9] sm:$0xff] %vm15_vm0, %v161_v57  ;;  %227 = vst.msk [vmem:[#allocation2 + $0x201] sm:$0xff] %vm15_vm0, %v162_v58 }
  0x46   :  { %v371_v49 = vld [vmem:[#allocation2 + $0x2a1] sm:$0xff]  ;;  %v372_v50 = vld [vmem:[#allocation2 + $0x2a9] sm:$0xff]  ;;  %v5170_v56 = vpack.c.bf16 %v340_v48, %v339_v47  ;;  %212 = vst.msk [vmem:[#allocation2 + $0x121] sm:$0xff] %vm15_vm0, %v147_v59  ;;  %213 = vst.msk [vmem:[#allocation2 + $0x129] sm:$0xff] %vm15_vm0, %v148_v61 }
  0x47   :  { %v5218_v60 = vpack.c.bf16 %v372_v50, %v371_v49  ;;  %v323_v0 = vld [vmem:[#allocation2 + $0x31] sm:$0xff]  ;;  %v324_v1 = vld [vmem:[#allocation2 + $0x39] sm:$0xff]  ;;  %244 = vst.msk [vmem:[#allocation2 + $0x2d1] sm:$0xff] %vm15_vm0, %v179_v62  ;;  %245 = vst.msk [vmem:[#allocation2 + $0x2d9] sm:$0xff] %vm15_vm0, %v180_v63 }
  0x48   :  { %v355_v6 = vld [vmem:[#allocation2 + $0x1e1] sm:$0xff]  ;;  %v356_v7 = vld [vmem:[#allocation2 + $0x1e9] sm:$0xff]  ;;  %196 = vst.msk [vmem:[#allocation2 + $0x61] sm:$0xff] %vm15_vm0, %v131_v2  ;;  %197 = vst.msk [vmem:[#allocation2 + $0x69] sm:$0xff] %vm15_vm0, %v132_v3  ;;  %v5173_v23 = vpack.c.bf16 %v324_v1, %v323_v0 }
  0x49   :  { %v341_v8 = vld [vmem:[#allocation2 + $0x109] sm:$0xff]  ;;  %v342_v9 = vld [vmem:[#allocation2 + $0x111] sm:$0xff]  ;;  %228 = vst.msk [vmem:[#allocation2 + $0x211] sm:$0xff] %vm15_vm0, %v163_v5  ;;  %229 = vst.msk [vmem:[#allocation2 + $0x219] sm:$0xff] %vm15_vm0, %v164_v10  ;;  %v5221_v25 = vpack.c.bf16 %v356_v7, %v355_v6 }
  0x4a   :  { %v373_v13 = vld [vmem:[#allocation2 + $0x2b9] sm:$0xff]  ;;  %214 = vst.msk [vmem:[#allocation2 + $0x139] sm:$0xff] %vm15_vm0, %v149_v11  ;;  %215 = vst.msk [vmem:[#allocation2 + $0x141] sm:$0xff] %vm15_vm0, %v150_v12  ;;  %v134_v17 = vld [vmem:[%s7666_s0 + $0x48] sm:$0xff]  ;;  %v5176_v26 = vpack.c.bf16 %v342_v9, %v341_v8 }
  0x4b   :  { %5169 = vmatpush3.bf16.xpose.msk.msra.mxu0 %vm6132_vm2, %v5167_v52  ;;  %v133_v16 = vld [vmem:[%s7666_s0 + $0x40] sm:$0xff]  ;;  %246 = vst.msk [vmem:[#allocation2 + $0x2e9] sm:$0xff] %vm15_vm0, %v181_v14  ;;  %247 = vst.msk [vmem:[#allocation2 + $0x2f1] sm:$0xff] %vm15_vm0, %v182_v15  ;;  %v166_v19 = vld [vmem:[%s7666_s0 + $0x148] sm:$0xff] }
  0x4c   :  { %5217 = vmatpush3.bf16.xpose.msk.msra.mxu1 %vm6132_vm2, %v5215_v55  ;;  %5172 = vmatprep.subr.msk.bf16.mxu0 %vm6132_vm2, %v5170_v56  ;;  %198 = vst.msk [vmem:[#allocation2 + $0x79] sm:$0xff] %vm15_vm0, %v133_v16  ;;  %v165_v18 = vld [vmem:[%s7666_s0 + $0x140] sm:$0xff]  ;;  %199 = vst.msk [vmem:[#allocation2 + $0x81] sm:$0xff] %vm15_vm0, %v134_v17  ;;  %v151_v21 = vld [vmem:[%s7666_s0 + $0xd0] sm:$0xff] }
  0x4d   :  { %5220 = vmatprep.subr.msk.bf16.mxu1 %vm6132_vm2, %v5218_v60  ;;  %v374_v20 = vld [vmem:[#allocation2 + $0x2c1] sm:$0xff]  ;;  %230 = vst.msk [vmem:[#allocation2 + $0x229] sm:$0xff] %vm15_vm0, %v165_v18  ;;  %231 = vst.msk [vmem:[#allocation2 + $0x231] sm:$0xff] %vm15_vm0, %v166_v19  ;;  %v152_v22 = vld [vmem:[%s7666_s0 + $0xd8] sm:$0xff] }
  0x4e   :  { %216 = vst.msk [vmem:[#allocation2 + $0x151] sm:$0xff] %vm15_vm0, %v151_v21  ;;  %217 = vst.msk [vmem:[#allocation2 + $0x159] sm:$0xff] %vm15_vm0, %v152_v22  ;;  %v183_v24 = vld [vmem:[%s7666_s0 + $0x1d0] sm:$0xff]  ;;  %v5224_v27 = vpack.c.bf16 %v374_v20, %v373_v13  ;;  %v357_v30 = vld [vmem:[#allocation2 + $0x1f9] sm:$0xff] }
  0x4f   :  { %248 = vst.msk [vmem:[#allocation2 + $0x301] sm:$0xff] %vm15_vm0, %v183_v24  ;;  %v325_v28 = vld [vmem:[#allocation2 + $0x49] sm:$0xff]  ;;  %v326_v29 = vld [vmem:[#allocation2 + $0x51] sm:$0xff]  ;;  %v358_v31 = vld [vmem:[#allocation2 + $0x201] sm:$0xff] }
  0x50   :  { %v343_v32 = vld [vmem:[#allocation2 + $0x121] sm:$0xff]  ;;  %v344_v33 = vld [vmem:[#allocation2 + $0x129] sm:$0xff]  ;;  %v375_v34 = vld [vmem:[#allocation2 + $0x2d1] sm:$0xff]  ;;  %v5179_v37 = vpack.c.bf16 %v326_v29, %v325_v28  ;;  %v5227_v40 = vpack.c.bf16 %v358_v31, %v357_v30 }
  0x51   :  { %v376_v35 = vld [vmem:[#allocation2 + $0x2d9] sm:$0xff]  ;;  %v135_v38 = vld [vmem:[%s7666_s0 + $0x50] sm:$0xff]  ;;  %v5182_v41 = vpack.c.bf16 %v344_v33, %v343_v32  ;;  %v154_v46 = vld [vmem:[%s7666_s0 + $0xe8] sm:$0xff] }
  0x52   :  { %v184_v36 = vld [vmem:[%s7666_s0 + $0x1d8] sm:$0xff]  ;;  %200 = vst.msk [vmem:[#allocation2 + $0x91] sm:$0xff] %vm15_vm0, %v135_v38  ;;  %v167_v42 = vld [vmem:[%s7666_s0 + $0x150] sm:$0xff]  ;;  %v153_v44 = vld [vmem:[%s7666_s0 + $0xe0] sm:$0xff]  ;;  %v5230_v45 = vpack.c.bf16 %v376_v35, %v375_v34 }
  0x53   :  { %5175 = vmatpush3.bf16.xpose.msk.msra.mxu0 %vm6132_vm2, %v5173_v23  ;;  %249 = vst.msk [vmem:[#allocation2 + $0x309] sm:$0xff] %vm15_vm0, %v184_v36  ;;  %v136_v39 = vld [vmem:[%s7666_s0 + $0x58] sm:$0xff]  ;;  %232 = vst.msk [vmem:[#allocation2 + $0x241] sm:$0xff] %vm15_vm0, %v167_v42  ;;  %v185_v47 = vld [vmem:[%s7666_s0 + $0x1e0] sm:$0xff] }
  0x54   :  { %5223 = vmatpush3.bf16.xpose.msk.msra.mxu1 %vm6132_vm2, %v5221_v25  ;;  %5178 = vmatprep.subr.msk.bf16.mxu0 %vm6132_vm2, %v5176_v26  ;;  %201 = vst.msk [vmem:[#allocation2 + $0x99] sm:$0xff] %vm15_vm0, %v136_v39  ;;  %v168_v43 = vld [vmem:[%s7666_s0 + $0x158] sm:$0xff]  ;;  %218 = vst.msk [vmem:[#allocation2 + $0x169] sm:$0xff] %vm15_vm0, %v153_v44  ;;  %v186_v48 = vld [vmem:[%s7666_s0 + $0x1e8] sm:$0xff] }
  0x55   :  { %5226 = vmatprep.subr.msk.bf16.mxu1 %vm6132_vm2, %v5224_v27  ;;  %233 = vst.msk [vmem:[#allocation2 + $0x249] sm:$0xff] %vm15_vm0, %v168_v43  ;;  %219 = vst.msk [vmem:[#allocation2 + $0x171] sm:$0xff] %vm15_vm0, %v154_v46  ;;  %v137_v49 = vld [vmem:[%s7666_s0 + $0x60] sm:$0xff]  ;;  %v138_v50 = vld [vmem:[%s7666_s0 + $0x68] sm:$0xff] }
  0x56   :  { %250 = vst.msk [vmem:[#allocation2 + $0x319] sm:$0xff] %vm15_vm0, %v185_v47  ;;  %251 = vst.msk [vmem:[#allocation2 + $0x321] sm:$0xff] %vm15_vm0, %v186_v48  ;;  %v169_v51 = vld [vmem:[%s7666_s0 + $0x160] sm:$0xff]  ;;  %v170_v52 = vld [vmem:[%s7666_s0 + $0x168] sm:$0xff] }
  0x57   :  { %202 = vst.msk [vmem:[#allocation2 + $0xa9] sm:$0xff] %vm15_vm0, %v137_v49  ;;  %203 = vst.msk [vmem:[#allocation2 + $0xb1] sm:$0xff] %vm15_vm0, %v138_v50  ;;  %v6612_v53 = vld [vmem:[%s7667_s1 + $0x8] sm:$0xff]  ;;  %v359_v56 = vld [vmem:[#allocation2 + $0x211] sm:$0xff] }
  0x58   :  { %234 = vst.msk [vmem:[#allocation2 + $0x259] sm:$0xff] %vm15_vm0, %v169_v51  ;;  %v327_v54 = vld [vmem:[#allocation2 + $0x61] sm:$0xff]  ;;  %v328_v55 = vld [vmem:[#allocation2 + $0x69] sm:$0xff]  ;;  %235 = vst.msk [vmem:[#allocation2 + $0x261] sm:$0xff] %vm15_vm0, %v170_v52  ;;  %4578 = vmatprep.mubr.msk.f32.mxu0 %vm15_vm0, %v6612_v53  ;;  %4612 = vmatprep.mubr.msk.f32.mxu1 %vm15_vm0, %v6612_v53 }
  0x59   :  { %v360_v57 = vld [vmem:[#allocation2 + $0x219] sm:$0xff]  ;;  %v346_v59 = vld [vmem:[#allocation2 + $0x141] sm:$0xff]  ;;  %v377_v60 = vld [vmem:[#allocation2 + $0x2e9] sm:$0xff]  ;;  %v5185_v62 = vpack.c.bf16 %v328_v55, %v327_v54 }
  0x5a   :  { %v345_v58 = vld [vmem:[#allocation2 + $0x139] sm:$0xff]  ;;  %v378_v61 = vld [vmem:[#allocation2 + $0x2f1] sm:$0xff]  ;;  %v5233_v63 = vpack.c.bf16 %v360_v57, %v359_v56  ;;  %v330_v3 = vld [vmem:[#allocation2 + $0x81] sm:$0xff] }
  0x5b   :  { %5181 = vmatpush3.bf16.xpose.msk.msra.mxu0 %vm6132_vm2, %v5179_v37  ;;  %v5188_v0 = vpack.c.bf16 %v346_v59, %v345_v58  ;;  %v5236_v1 = vpack.c.bf16 %v378_v61, %v377_v60  ;;  %v329_v2 = vld [vmem:[#allocation2 + $0x79] sm:$0xff]  ;;  %v361_v5 = vld [vmem:[#allocation2 + $0x229] sm:$0xff]  ;;  %v362_v6 = vld [vmem:[#allocation2 + $0x231] sm:$0xff] }
  0x5c   :  { %5229 = vmatpush3.bf16.xpose.msk.msra.mxu1 %vm6132_vm2, %v5227_v40  ;;  %5184 = vmatprep.subr.msk.bf16.mxu0 %vm6132_vm2, %v5182_v41  ;;  %v347_v7 = vld [vmem:[#allocation2 + $0x151] sm:$0xff]  ;;  %v348_v8 = vld [vmem:[#allocation2 + $0x159] sm:$0xff]  ;;  %v379_v9 = vld [vmem:[#allocation2 + $0x301] sm:$0xff]  ;;  %v5191_v11 = vpack.c.bf16 %v330_v3, %v329_v2  ;;  %v5239_v12 = vpack.c.bf16 %v362_v6, %v361_v5 }
  0x5d   :  { %5232 = vmatprep.subr.msk.bf16.mxu1 %vm6132_vm2, %v5230_v45  ;;  %v380_v10 = vld [vmem:[#allocation2 + $0x309] sm:$0xff]  ;;  %v5194_v13 = vpack.c.bf16 %v348_v8, %v347_v7  ;;  %v331_v15 = vld [vmem:[#allocation2 + $0x91] sm:$0xff]  ;;  %v332_v16 = vld [vmem:[#allocation2 + $0x99] sm:$0xff] }
  0x5e   :  { %v5242_v14 = vpack.c.bf16 %v380_v10, %v379_v9  ;;  %v363_v17 = vld [vmem:[#allocation2 + $0x241] sm:$0xff]  ;;  %v364_v18 = vld [vmem:[#allocation2 + $0x249] sm:$0xff]  ;;  %v350_v20 = vld [vmem:[#allocation2 + $0x171] sm:$0xff]  ;;  %v5197_v23 = vpack.c.bf16 %v332_v16, %v331_v15 }
  0x5f   :  { %v349_v19 = vld [vmem:[#allocation2 + $0x169] sm:$0xff]  ;;  %v381_v21 = vld [vmem:[#allocation2 + $0x319] sm:$0xff]  ;;  %v382_v22 = vld [vmem:[#allocation2 + $0x321] sm:$0xff]  ;;  %v5245_v24 = vpack.c.bf16 %v364_v18, %v363_v17 }
  0x60   :  { %v5200_v25 = vpack.c.bf16 %v350_v20, %v349_v19  ;;  %v5248_v26 = vpack.c.bf16 %v382_v22, %v381_v21  ;;  %v333_v27 = vld [vmem:[#allocation2 + $0xa9] sm:$0xff]  ;;  %v334_v28 = vld [vmem:[#allocation2 + $0xb1] sm:$0xff]  ;;  %v270_v29 = vld [vmem:[#allocation2 + $0xc0] sm:$0xff] }
  0x61   :  { %v365_v30 = vld [vmem:[#allocation2 + $0x259] sm:$0xff]  ;;  %v366_v31 = vld [vmem:[#allocation2 + $0x261] sm:$0xff]  ;;  %v302_v33 = vld [vmem:[#allocation2 + $0x270] sm:$0xff]  ;;  %v5203_v35 = vpack.c.bf16 %v334_v28, %v333_v27 }
  0x62   :  { %v271_v32 = vld [vmem:[#allocation2 + $0xc8] sm:$0xff]  ;;  %v303_v34 = vld [vmem:[#allocation2 + $0x278] sm:$0xff]  ;;  %v5251_v36 = vpack.c.bf16 %v366_v31, %v365_v30  ;;  %v254_v39 = vld [vmem:[#allocation2] sm:$0xff] }
  0x63   :  { %5187 = vmatpush3.bf16.xpose.msk.msra.mxu0 %vm6132_vm2, %v5185_v62  ;;  %v6649_v37 = vpack.c.bf16 %v271_v32, %v270_v29  ;;  %v6651_v38 = vpack.c.bf16 %v303_v34, %v302_v33  ;;  %v255_v40 = vld [vmem:[#allocation2 + $0x8] sm:$0xff]  ;;  %v286_v41 = vld [vmem:[#allocation2 + $0x1b0] sm:$0xff]  ;;  %v287_v42 = vld [vmem:[#allocation2 + $0x1b8] sm:$0xff] }
  0x64   :  { %5235 = vmatpush3.bf16.xpose.msk.msra.mxu1 %vm6132_vm2, %v5233_v63  ;;  %5190 = vmatprep.subr.msk.bf16.mxu0 %vm6132_vm2, %v5188_v0  ;;  %v272_v43 = vld [vmem:[#allocation2 + $0xd8] sm:$0xff]  ;;  %v273_v44 = vld [vmem:[#allocation2 + $0xe0] sm:$0xff]  ;;  %v304_v45 = vld [vmem:[#allocation2 + $0x288] sm:$0xff]  ;;  %v5257_v47 = vpack.c.bf16 %v255_v40, %v254_v39  ;;  %v5305_v48 = vpack.c.bf16 %v287_v42, %v286_v41 }
  0x65   :  { %5238 = vmatprep.subr.msk.bf16.mxu1 %vm6132_vm2, %v5236_v1  ;;  %v305_v46 = vld [vmem:[#allocation2 + $0x290] sm:$0xff]  ;;  %v6663_v49 = vpack.c.bf16 %v273_v44, %v272_v43  ;;  %v6672_v51 = vld [vmem:[%s7667_s1] sm:$0xff]  ;;  %v256_v52 = vld [vmem:[#allocation2 + $0x18] sm:$0xff] }
  0x66   :  { %v6665_v50 = vpack.c.bf16 %v305_v46, %v304_v45  ;;  %v257_v54 = vld [vmem:[#allocation2 + $0x20] sm:$0xff]  ;;  %v288_v55 = vld [vmem:[#allocation2 + $0x1c8] sm:$0xff]  ;;  %v289_v56 = vld [vmem:[#allocation2 + $0x1d0] sm:$0xff] }
  0x67   :  { %v274_v57 = vld [vmem:[#allocation2 + $0xf0] sm:$0xff]  ;;  %v306_v58 = vld [vmem:[#allocation2 + $0x2a0] sm:$0xff]  ;;  %v307_v59 = vld [vmem:[#allocation2 + $0x2a8] sm:$0xff]  ;;  %v6690_v60 = vpack.c.bf16 %v257_v54, %v256_v52  ;;  %v6692_v61 = vpack.c.bf16 %v289_v56, %v288_v55 }
  0x68   :  { %v6696_v63 = vpack.c.bf16 %v307_v59, %v306_v58 }
  0x6b   :  { %5193 = vmatpush3.bf16.xpose.msk.msra.mxu0 %vm6132_vm2, %v5191_v11 }
  0x6c   :  { %5241 = vmatpush3.bf16.xpose.msk.msra.mxu1 %vm6132_vm2, %v5239_v12  ;;  %5196 = vmatprep.subr.msk.bf16.mxu0 %vm6132_vm2, %v5194_v13 }
  0x6d   :  { %5244 = vmatprep.subr.msk.bf16.mxu1 %vm6132_vm2, %v5242_v14 }
  0x73   :  { %5199 = vmatpush3.bf16.xpose.msk.msra.mxu0 %vm6132_vm2, %v5197_v23 }
  0x74   :  { %5247 = vmatpush3.bf16.xpose.msk.msra.mxu1 %vm6132_vm2, %v5245_v24  ;;  %5202 = vmatprep.subr.msk.bf16.mxu0 %vm6132_vm2, %v5200_v25 }
  0x75   :  { %5250 = vmatprep.subr.msk.bf16.mxu1 %vm6132_vm2, %v5248_v26 }
  0x7b   :  { %5205 = vmatpush3.bf16.xpose.msk.msra.mxu0 %vm6132_vm2, %v5203_v35 }
  0x7c   :  { %5253 = vmatpush3.bf16.xpose.msk.msra.mxu1 %vm6132_vm2, %v5251_v36  ;;  %5256 = vmatprep.subr.msk.bf16.mxu0 %vm6132_vm2, %v6649_v37 }
  0x7d   :  { %5304 = vmatprep.subr.msk.bf16.mxu1 %vm6132_vm2, %v6651_v38 }
  0x82   :  { %4579 = vmatmul.mubr.msk.f32.vlgmr.msra.gmra.mrb[0].mxu0 %vm15_vm0, %v6612_v53 }
  0x83   :  { %4613 = vmatmul.mubr.msk.f32.vlgmr.msra.gmra.mrb[0].mxu1 %vm15_vm0, %v6612_v53  ;;  %5259 = vmatpush3.bf16.xpose.msk.msra.mxu0 %vm6132_vm2, %v5257_v47  ;;  %v275_v53 = vld [vmem:[#allocation2 + $0xf8] sm:$0xff] }
  0x84   :  { %5307 = vmatpush3.bf16.xpose.msk.msra.mxu1 %vm6132_vm2, %v5305_v48  ;;  %5262 = vmatprep.subr.msk.bf16.mxu0 %vm6132_vm2, %v6663_v49  ;;  %v6694_v62 = vpack.c.bf16 %v275_v53, %v274_v57 }
  0x85   :  { %5310 = vmatprep.subr.msk.bf16.mxu1 %vm6132_vm2, %v6665_v50  ;;  %4646 = vmatprep.mubr.msk.f32.mxu0 %vm15_vm0, %v6672_v51 }
  0x86   :  { %4680 = vmatprep.mubr.msk.f32.mxu1 %vm15_vm0, %v6672_v51 }
  0x8b   :  { %5265 = vmatpush3.bf16.xpose.msk.msra.mxu0 %vm6132_vm2, %v6690_v60 }
  0x8c   :  { %8 = vsyncpa [#allocation4], 0  ;;  %5313 = vmatpush3.bf16.xpose.msk.msra.mxu1 %vm6132_vm2, %v6692_v61  ;;  %5268 = vmatprep.subr.msk.bf16.mxu0 %vm6132_vm2, %v6694_v62  ;;  %v258_v0 = vld [vmem:[#allocation2 + $0x30] sm:$0xff]  ;;  %v259_v1 = vld [vmem:[#allocation2 + $0x38] sm:$0xff] }
  0x8d   :  { %v290_v2 = vld [vmem:[#allocation2 + $0x1e0] sm:$0xff]  ;;  %5316 = vmatprep.subr.msk.bf16.mxu1 %vm6132_vm2, %v6696_v63  ;;  %v291_v3 = vld [vmem:[#allocation2 + $0x1e8] sm:$0xff]  ;;  %v277_v6 = vld [vmem:[#allocation2 + $0x110] sm:$0xff]  ;;  %v6710_v9 = vpack.c.bf16 %v259_v1, %v258_v0 }
  0x8e   :  { %v276_v5 = vld [vmem:[#allocation2 + $0x108] sm:$0xff]  ;;  %v308_v7 = vld [vmem:[#allocation2 + $0x2b8] sm:$0xff]  ;;  %v309_v8 = vld [vmem:[#allocation2 + $0x2c0] sm:$0xff]  ;;  %v6712_v10 = vpack.c.bf16 %v291_v3, %v290_v2 }
  0x8f   :  { %v6714_v11 = vpack.c.bf16 %v277_v6, %v276_v5  ;;  %v6716_v12 = vpack.c.bf16 %v309_v8, %v308_v7  ;;  %v260_v13 = vld [vmem:[#allocation2 + $0x48] sm:$0xff]  ;;  %v261_v14 = vld [vmem:[#allocation2 + $0x50] sm:$0xff]  ;;  %v292_v15 = vld [vmem:[#allocation2 + $0x1f8] sm:$0xff] }
  0x90   :  { %v293_v16 = vld [vmem:[#allocation2 + $0x200] sm:$0xff]  ;;  %v279_v18 = vld [vmem:[#allocation2 + $0x128] sm:$0xff]  ;;  %v310_v19 = vld [vmem:[#allocation2 + $0x2d0] sm:$0xff]  ;;  %v6730_v21 = vpack.c.bf16 %v261_v14, %v260_v13 }
  0x91   :  { %v278_v17 = vld [vmem:[#allocation2 + $0x120] sm:$0xff]  ;;  %v311_v20 = vld [vmem:[#allocation2 + $0x2d8] sm:$0xff]  ;;  %v6732_v22 = vpack.c.bf16 %v293_v16, %v292_v15  ;;  %v263_v26 = vld [vmem:[#allocation2 + $0x68] sm:$0xff] }
  0x92   :  { %v6734_v23 = vpack.c.bf16 %v279_v18, %v278_v17  ;;  %v6736_v24 = vpack.c.bf16 %v311_v20, %v310_v19  ;;  %v262_v25 = vld [vmem:[#allocation2 + $0x60] sm:$0xff]  ;;  %v294_v27 = vld [vmem:[#allocation2 + $0x210] sm:$0xff]  ;;  %v295_v28 = vld [vmem:[#allocation2 + $0x218] sm:$0xff] }
  0x93   :  { %5271 = vmatpush3.bf16.xpose.msk.msra.mxu0 %vm6132_vm2, %v6710_v9  ;;  %v280_v29 = vld [vmem:[#allocation2 + $0x138] sm:$0xff]  ;;  %v281_v30 = vld [vmem:[#allocation2 + $0x140] sm:$0xff]  ;;  %v312_v31 = vld [vmem:[#allocation2 + $0x2e8] sm:$0xff]  ;;  %v6750_v33 = vpack.c.bf16 %v263_v26, %v262_v25  ;;  %v6752_v34 = vpack.c.bf16 %v295_v28, %v294_v27 }
  0x94   :  { %5319 = vmatpush3.bf16.xpose.msk.msra.mxu1 %vm6132_vm2, %v6712_v10  ;;  %5274 = vmatprep.subr.msk.bf16.mxu0 %vm6132_vm2, %v6714_v11  ;;  %v313_v32 = vld [vmem:[#allocation2 + $0x2f0] sm:$0xff]  ;;  %v6754_v35 = vpack.c.bf16 %v281_v30, %v280_v29  ;;  %v264_v39 = vld [vmem:[#allocation2 + $0x78] sm:$0xff]  ;;  %v265_v40 = vld [vmem:[#allocation2 + $0x80] sm:$0xff] }
  0x95   :  { %5322 = vmatprep.subr.msk.bf16.mxu1 %vm6132_vm2, %v6716_v12  ;;  %v6756_v36 = vpack.c.bf16 %v313_v32, %v312_v31  ;;  %v296_v41 = vld [vmem:[#allocation2 + $0x228] sm:$0xff]  ;;  %v297_v42 = vld [vmem:[#allocation2 + $0x230] sm:$0xff]  ;;  %v283_v44 = vld [vmem:[#allocation2 + $0x158] sm:$0xff]  ;;  %v6770_v47 = vpack.c.bf16 %v265_v40, %v264_v39 }
  0x96   :  { %v282_v43 = vld [vmem:[#allocation2 + $0x150] sm:$0xff]  ;;  %v314_v45 = vld [vmem:[#allocation2 + $0x300] sm:$0xff]  ;;  %v315_v46 = vld [vmem:[#allocation2 + $0x308] sm:$0xff]  ;;  %v6772_v48 = vpack.c.bf16 %v297_v42, %v296_v41 }
  0x97   :  { %v6774_v52 = vpack.c.bf16 %v283_v44, %v282_v43  ;;  %v6776_v54 = vpack.c.bf16 %v315_v46, %v314_v45  ;;  %v266_v55 = vld [vmem:[#allocation2 + $0x90] sm:$0xff]  ;;  %v267_v56 = vld [vmem:[#allocation2 + $0x98] sm:$0xff]  ;;  %v298_v57 = vld [vmem:[#allocation2 + $0x240] sm:$0xff] }
  0x98   :  { %v299_v53 = vld [vmem:[#allocation2 + $0x248] sm:$0xff]  ;;  %v285_v59 = vld [vmem:[#allocation2 + $0x170] sm:$0xff]  ;;  %v316_v0 = vld [vmem:[#allocation2 + $0x318] sm:$0xff]  ;;  %v6790_v2 = vpack.c.bf16 %v267_v56, %v266_v55 }
  0x99   :  { %v284_v58 = vld [vmem:[#allocation2 + $0x168] sm:$0xff]  ;;  %v317_v1 = vld [vmem:[#allocation2 + $0x320] sm:$0xff]  ;;  %v6792_v3 = vpack.c.bf16 %v299_v53, %v298_v57  ;;  %v155_v6 = vld [vmem:[%s7666_s0 + $0xf0] sm:$0xff] }
  0x9a   :  { %v6794_v5 = vpack.c.bf16 %v285_v59, %v284_v58  ;;  %v156_v7 = vld [vmem:[%s7666_s0 + $0xf8] sm:$0xff]  ;;  %v187_v8 = vld [vmem:[%s7666_s0 + $0x1f0] sm:$0xff]  ;;  %v6805_v13 = vpack.c.bf16 %v317_v1, %v316_v0  ;;  %220 = vst.msk [vmem:[#allocation2 + $0x181] sm:$0xff] %vm15_vm0, %v155_v6  ;;  %v268_v15 = vld [vmem:[#allocation2 + $0xa8] sm:$0xff] }
  0x9b   :  { %5277 = vmatpush3.bf16.xpose.msk.msra.mxu0 %vm6132_vm2, %v6730_v21  ;;  %221 = vst.msk [vmem:[#allocation2 + $0x189] sm:$0xff] %vm15_vm0, %v156_v7  ;;  %v188_v14 = vld [vmem:[%s7666_s0 + $0x1f8] sm:$0xff]  ;;  %252 = vst.msk [vmem:[#allocation2 + $0x331] sm:$0xff] %vm15_vm0, %v187_v8  ;;  %v269_v16 = vld [vmem:[#allocation2 + $0xb0] sm:$0xff] }
  0x9c   :  { %5325 = vmatpush3.bf16.xpose.msk.msra.mxu1 %vm6132_vm2, %v6732_v22  ;;  %5280 = vmatprep.subr.msk.bf16.mxu0 %vm6132_vm2, %v6734_v23  ;;  %253 = vst.msk [vmem:[#allocation2 + $0x339] sm:$0xff] %vm15_vm0, %v188_v14  ;;  %v300_v17 = vld [vmem:[#allocation2 + $0x258] sm:$0xff]  ;;  %v301_v18 = vld [vmem:[#allocation2 + $0x260] sm:$0xff]  ;;  %v1076_v20 = vld [vmem:[#allocation2 + $0xca] sm:$0xff]  ;;  %v6826_v27 = vpack.c.bf16 %v269_v16, %v268_v15 }
  0x9d   :  { %5328 = vmatprep.subr.msk.bf16.mxu1 %vm6132_vm2, %v6736_v24  ;;  %v1075_v19 = vld [vmem:[#allocation2 + $0xc2] sm:$0xff]  ;;  %v1107_v25 = vld [vmem:[#allocation2 + $0x272] sm:$0xff]  ;;  %v1108_v26 = vld [vmem:[#allocation2 + $0x27a] sm:$0xff]  ;;  %v6828_v28 = vpack.c.bf16 %v301_v18, %v300_v17 }
  0x9e   :  { %v5350_v29 = vpack.c.bf16 %v1076_v20, %v1075_v19  ;;  %v5398_v30 = vpack.c.bf16 %v1108_v26, %v1107_v25  ;;  %v1059_v31 = vld [vmem:[#allocation2 + $0x2] sm:$0xff]  ;;  %v1060_v32 = vld [vmem:[#allocation2 + $0xa] sm:$0xff]  ;;  %v1091_v39 = vld [vmem:[#allocation2 + $0x1b2] sm:$0xff] }
  0x9f   :  { %v1092_v40 = vld [vmem:[#allocation2 + $0x1ba] sm:$0xff]  ;;  %v1078_v42 = vld [vmem:[#allocation2 + $0xe2] sm:$0xff]  ;;  %v1109_v43 = vld [vmem:[#allocation2 + $0x28a] sm:$0xff]  ;;  %v5353_v45 = vpack.c.bf16 %v1060_v32, %v1059_v31 }
  0xa0   :  { %v1077_v41 = vld [vmem:[#allocation2 + $0xda] sm:$0xff]  ;;  %v1110_v44 = vld [vmem:[#allocation2 + $0x292] sm:$0xff]  ;;  %v5401_v46 = vpack.c.bf16 %v1092_v40, %v1091_v39  ;;  %v1062_v58 = vld [vmem:[#allocation2 + $0x22] sm:$0xff] }
  0xa1   :  { %v6840_v55 = vpack.c.bf16 %v1078_v42, %v1077_v41  ;;  %v6842_v56 = vpack.c.bf16 %v1110_v44, %v1109_v43  ;;  %v6849_v57 = vld [vmem:[%s7667_s1 + $0x10] sm:$0xff]  ;;  %v1061_v53 = vld [vmem:[#allocation2 + $0x1a] sm:$0xff]  ;;  %v1111_v6 = vld [vmem:[#allocation2 + $0x2a2] sm:$0xff] }
  0xa2   :  { %v1093_v59 = vld [vmem:[#allocation2 + $0x1ca] sm:$0xff]  ;;  %v1094_v0 = vld [vmem:[#allocation2 + $0x1d2] sm:$0xff]  ;;  %v6867_v8 = vpack.c.bf16 %v1062_v58, %v1061_v53  ;;  %v1064_v18 = vld [vmem:[#allocation2 + $0x3a] sm:$0xff] }
  0xa3   :  { %5283 = vmatpush3.bf16.xpose.msk.msra.mxu0 %vm6132_vm2, %v6750_v33  ;;  %v1079_v1 = vld [vmem:[#allocation2 + $0xf2] sm:$0xff]  ;;  %v1112_v7 = vld [vmem:[#allocation2 + $0x2aa] sm:$0xff]  ;;  %v6869_v14 = vpack.c.bf16 %v1094_v0, %v1093_v59  ;;  %v1095_v19 = vld [vmem:[#allocation2 + $0x1e2] sm:$0xff] }
  0xa4   :  { %5331 = vmatpush3.bf16.xpose.msk.msra.mxu1 %vm6132_vm2, %v6752_v34  ;;  %5286 = vmatprep.subr.msk.bf16.mxu0 %vm6132_vm2, %v6754_v35  ;;  %v6873_v16 = vpack.c.bf16 %v1112_v7, %v1111_v6  ;;  %v1063_v17 = vld [vmem:[#allocation2 + $0x32] sm:$0xff]  ;;  %v1096_v20 = vld [vmem:[#allocation2 + $0x1ea] sm:$0xff]  ;;  %v1097_v43 = vld [vmem:[#allocation2 + $0x1fa] sm:$0xff] }
  0xa5   :  { %5334 = vmatprep.subr.msk.bf16.mxu1 %vm6132_vm2, %v6756_v36  ;;  %v1081_v25 = vld [vmem:[#allocation2 + $0x10a] sm:$0xff]  ;;  %v1082_v26 = vld [vmem:[#allocation2 + $0x112] sm:$0xff]  ;;  %v6887_v31 = vpack.c.bf16 %v1064_v18, %v1063_v17  ;;  %v6889_v32 = vpack.c.bf16 %v1096_v20, %v1095_v19  ;;  %v1098_v44 = vld [vmem:[#allocation2 + $0x202] sm:$0xff] }
  0xa6   :  { %v6891_v39 = vpack.c.bf16 %v1082_v26, %v1081_v25  ;;  %v1065_v41 = vld [vmem:[#allocation2 + $0x4a] sm:$0xff]  ;;  %v1066_v42 = vld [vmem:[#allocation2 + $0x52] sm:$0xff]  ;;  %v1116_v58 = vld [vmem:[#allocation2 + $0x2da] sm:$0xff]  ;;  %v6909_v0 = vpack.c.bf16 %v1098_v44, %v1097_v43 }
  0xa7   :  { %v1115_v53 = vld [vmem:[#allocation2 + $0x2d2] sm:$0xff]  ;;  %v6907_v59 = vpack.c.bf16 %v1066_v42, %v1065_v41  ;;  %v1067_v6 = vld [vmem:[#allocation2 + $0x62] sm:$0xff]  ;;  %v1068_v7 = vld [vmem:[#allocation2 + $0x6a] sm:$0xff] }
  0xa8   :  { %v1099_v17 = vld [vmem:[#allocation2 + $0x212] sm:$0xff]  ;;  %v1100_v18 = vld [vmem:[#allocation2 + $0x21a] sm:$0xff]  ;;  %v1086_v20 = vld [vmem:[#allocation2 + $0x142] sm:$0xff] }
  0xa9   :  { %v1085_v19 = vld [vmem:[#allocation2 + $0x13a] sm:$0xff]  ;;  %v1117_v25 = vld [vmem:[#allocation2 + $0x2ea] sm:$0xff]  ;;  %v1118_v26 = vld [vmem:[#allocation2 + $0x2f2] sm:$0xff] }
  0xaa   :  { %v6931_v41 = vpack.c.bf16 %v1086_v20, %v1085_v19  ;;  %v6933_v42 = vpack.c.bf16 %v1118_v26, %v1117_v25  ;;  %v1069_v43 = vld [vmem:[#allocation2 + $0x7a] sm:$0xff]  ;;  %v1070_v44 = vld [vmem:[#allocation2 + $0x82] sm:$0xff]  ;;  %v1071_v25 = vld [vmem:[#allocation2 + $0x92] sm:$0xff] }
  0xab   :  { %5289 = vmatpush3.bf16.xpose.msk.msra.mxu0 %vm6132_vm2, %v6770_v47  ;;  %v1072_v26 = vld [vmem:[#allocation2 + $0x9a] sm:$0xff] }
  0xac   :  { %5337 = vmatpush3.bf16.xpose.msk.msra.mxu1 %vm6132_vm2, %v6772_v48  ;;  %5292 = vmatprep.subr.msk.bf16.mxu0 %vm6132_vm2, %v6774_v52 }
  0xad   :  { %5340 = vmatprep.subr.msk.bf16.mxu1 %vm6132_vm2, %v6776_v54 }
  0xb3   :  { %5295 = vmatpush3.bf16.xpose.msk.msra.mxu0 %vm6132_vm2, %v6790_v2 }
  0xb4   :  { %5343 = vmatpush3.bf16.xpose.msk.msra.mxu1 %vm6132_vm2, %v6792_v3  ;;  %5298 = vmatprep.subr.msk.bf16.mxu0 %vm6132_vm2, %v6794_v5 }
  0xb5   :  { %5346 = vmatprep.subr.msk.bf16.mxu1 %vm6132_vm2, %v6805_v13 }
  0xbb   :  { %5301 = vmatpush3.bf16.xpose.msk.msra.mxu0 %vm6132_vm2, %v6826_v27 }
  0xbc   :  { %5349 = vmatpush3.bf16.xpose.msk.msra.mxu1 %vm6132_vm2, %v6828_v28  ;;  %5352 = vmatprep.subr.msk.bf16.mxu0 %vm6132_vm2, %v5350_v29  ;;  %v1113_v29 = vld [vmem:[#allocation2 + $0x2ba] sm:$0xff] }
  0xbd   :  { %5400 = vmatprep.subr.msk.bf16.mxu1 %vm6132_vm2, %v5398_v30  ;;  %v1114_v30 = vld [vmem:[#allocation2 + $0x2c2] sm:$0xff] }
  0xbe   :  { %v6893_v40 = vpack.c.bf16 %v1114_v30, %v1113_v29  ;;  %v6927_v29 = vpack.c.bf16 %v1068_v7, %v1067_v6  ;;  %v6929_v30 = vpack.c.bf16 %v1100_v18, %v1099_v17  ;;  %v1119_v6 = vld [vmem:[#allocation2 + $0x302] sm:$0xff]  ;;  %v1120_v7 = vld [vmem:[#allocation2 + $0x30a] sm:$0xff]  ;;  %v6947_v17 = vpack.c.bf16 %v1070_v44, %v1069_v43 }
  0xbf   :  { %v6953_v20 = vpack.c.bf16 %v1120_v7, %v1119_v6  ;;  %v1103_v43 = vld [vmem:[#allocation2 + $0x242] sm:$0xff]  ;;  %v1104_v44 = vld [vmem:[#allocation2 + $0x24a] sm:$0xff]  ;;  %v6967_v6 = vpack.c.bf16 %v1072_v26, %v1071_v25  ;;  %v1074_v26 = vld [vmem:[#allocation2 + $0xb2] sm:$0xff] }
  0xc0   :  { %7674 = vst [vmem:[#allocation6_spill] sm:$0xff] %v6947_v17  ;;  %v6969_v7 = vpack.c.bf16 %v1104_v44, %v1103_v43  ;;  %v1073_v25 = vld [vmem:[#allocation2 + $0xaa] sm:$0xff]  ;;  %v1105_v43 = vld [vmem:[#allocation2 + $0x25a] sm:$0xff]  ;;  %v1106_v44 = vld [vmem:[#allocation2 + $0x262] sm:$0xff] }
  0xc2   :  { %4647 = vmatmul.mubr.msk.f32.vlgmr.msra.gmra.mrb[0].mxu0 %vm15_vm0, %v6672_v51 }
  0xc3   :  { %4681 = vmatmul.mubr.msk.f32.vlgmr.msra.gmra.mrb[0].mxu1 %vm15_vm0, %v6672_v51  ;;  %5355 = vmatpush3.bf16.xpose.msk.msra.mxu0 %vm6132_vm2, %v5353_v45  ;;  %v1080_v51 = vld [vmem:[#allocation2 + $0xfa] sm:$0xff]  ;;  %v1083_v45 = vld [vmem:[#allocation2 + $0x122] sm:$0xff] }
  0xc4   :  { %5403 = vmatpush3.bf16.xpose.msk.msra.mxu1 %vm6132_vm2, %v5401_v46  ;;  %5358 = vmatprep.subr.msk.bf16.mxu0 %vm6132_vm2, %v6840_v55  ;;  %v6871_v15 = vpack.c.bf16 %v1080_v51, %v1079_v1  ;;  %v1084_v46 = vld [vmem:[#allocation2 + $0x12a] sm:$0xff]  ;;  %v6913_v51 = vpack.c.bf16 %v1116_v58, %v1115_v53  ;;  %v1087_v53 = vld [vmem:[#allocation2 + $0x152] sm:$0xff]  ;;  %v1088_v58 = vld [vmem:[#allocation2 + $0x15a] sm:$0xff] }
  0xc5   :  { %5406 = vmatprep.subr.msk.bf16.mxu1 %vm6132_vm2, %v6842_v56  ;;  %4714 = vmatprep.mubr.msk.f32.mxu0 %vm15_vm0, %v6849_v57  ;;  %v6911_v1 = vpack.c.bf16 %v1084_v46, %v1083_v45  ;;  %v1101_v45 = vld [vmem:[#allocation2 + $0x22a] sm:$0xff]  ;;  %v1102_v46 = vld [vmem:[#allocation2 + $0x232] sm:$0xff]  ;;  %v6951_v19 = vpack.c.bf16 %v1088_v58, %v1087_v53  ;;  %v1121_v53 = vld [vmem:[#allocation2 + $0x31a] sm:$0xff] }
  0xc6   :  { %4748 = vmatprep.mubr.msk.f32.mxu1 %vm15_vm0, %v6849_v57  ;;  %v6949_v18 = vpack.c.bf16 %v1102_v46, %v1101_v45  ;;  %v1089_v45 = vld [vmem:[#allocation2 + $0x16a] sm:$0xff]  ;;  %v1090_v46 = vld [vmem:[#allocation2 + $0x172] sm:$0xff]  ;;  %v1122_v58 = vld [vmem:[#allocation2 + $0x322] sm:$0xff] }
  0xc8   :  { %7675 = vst [vmem:[#allocation7_spill] sm:$0xff] %v6949_v18 }
  0xcb   :  { %5361 = vmatpush3.bf16.xpose.msk.msra.mxu0 %vm6132_vm2, %v6867_v8 }
  0xcc   :  { %5409 = vmatpush3.bf16.xpose.msk.msra.mxu1 %vm6132_vm2, %v6869_v14  ;;  %5364 = vmatprep.subr.msk.bf16.mxu0 %vm6132_vm2, %v6871_v15 }
  0xcd   :  { %5412 = vmatprep.subr.msk.bf16.mxu1 %vm6132_vm2, %v6873_v16 }
  0xd3   :  { %5367 = vmatpush3.bf16.xpose.msk.msra.mxu0 %vm6132_vm2, %v6887_v31 }
  0xd4   :  { %5415 = vmatpush3.bf16.xpose.msk.msra.mxu1 %vm6132_vm2, %v6889_v32  ;;  %5370 = vmatprep.subr.msk.bf16.mxu0 %vm6132_vm2, %v6891_v39 }
  0xd5   :  { %5418 = vmatprep.subr.msk.bf16.mxu1 %vm6132_vm2, %v6893_v40 }
  0xdb   :  { %5373 = vmatpush3.bf16.xpose.msk.msra.mxu0 %vm6132_vm2, %v6907_v59 }
  0xdc   :  { %5421 = vmatpush3.bf16.xpose.msk.msra.mxu1 %vm6132_vm2, %v6909_v0  ;;  %5376 = vmatprep.subr.msk.bf16.mxu0 %vm6132_vm2, %v6911_v1 }
  0xdd   :  { %5424 = vmatprep.subr.msk.bf16.mxu1 %vm6132_vm2, %v6913_v51 }
  0xe3   :  { %5379 = vmatpush3.bf16.xpose.msk.msra.mxu0 %vm6132_vm2, %v6927_v29 }
  0xe4   :  { %5427 = vmatpush3.bf16.xpose.msk.msra.mxu1 %vm6132_vm2, %v6929_v30  ;;  %5382 = vmatprep.subr.msk.bf16.mxu0 %vm6132_vm2, %v6931_v41 }
  0xe5   :  { %5430 = vmatprep.subr.msk.bf16.mxu1 %vm6132_vm2, %v6933_v42 }
  0xeb   :  { %5385 = vmatpush3.bf16.xpose.msk.msra.mxu0 %vm6132_vm2, %v6947_v17  ;;  %v6973_v17 = vpack.c.bf16 %v1122_v58, %v1121_v53  ;;  %v4144_v53 = vld [vmem:[%s7667_s1 + $0x18] sm:$0xff] }
  0xec   :  { %5433 = vmatpush3.bf16.xpose.msk.msra.mxu1 %vm6132_vm2, %v6949_v18  ;;  %5388 = vmatprep.subr.msk.bf16.mxu0 %vm6132_vm2, %v6951_v19  ;;  %v6971_v18 = vpack.c.bf16 %v1090_v46, %v1089_v45  ;;  %v6987_v45 = vpack.c.bf16 %v1074_v26, %v1073_v25  ;;  %v6989_v46 = vpack.c.bf16 %v1106_v44, %v1105_v43  ;;  %v1925_v58 = vld [vmem:[#allocation2 + $0x2b9] sm:$0xff]  ;;  %v1926_v25 = vld [vmem:[#allocation2 + $0x2c1] sm:$0xff] }
  0xed   :  { %5436 = vmatprep.subr.msk.bf16.mxu1 %vm6132_vm2, %v6953_v20 }
  0xf3   :  { %5391 = vmatpush3.bf16.xpose.msk.msra.mxu0 %vm6132_vm2, %v6967_v6 }
  0xf4   :  { %5439 = vmatpush3.bf16.xpose.msk.msra.mxu1 %vm6132_vm2, %v6969_v7  ;;  %5394 = vmatprep.subr.msk.bf16.mxu0 %vm6132_vm2, %v6971_v18 }
  0xf5   :  { %5442 = vmatprep.subr.msk.bf16.mxu1 %vm6132_vm2, %v6973_v17 }
  0xfb   :  { %5397 = vmatpush3.bf16.xpose.msk.msra.mxu0 %vm6132_vm2, %v6987_v45 }
  0xfc   :  { %5445 = vmatpush3.bf16.xpose.msk.msra.mxu1 %vm6132_vm2, %v6989_v46  ;;  %5448 = vmatprep.subr.msk.bf16.mxu0 %vm6132_vm2, %v6663_v49  ;;  %v1496_v49 = vld [vmem:[#allocation2 + $0x180] sm:$0xff] }
  0xfd   :  { %5496 = vmatprep.subr.msk.bf16.mxu1 %vm6132_vm2, %v6665_v50  ;;  %v1497_v50 = vld [vmem:[#allocation2 + $0x188] sm:$0xff] }
 0x102   :  { %4715 = vmatmul.mubr.msk.f32.vlgmr.msra.gmra.mrb[0].mxu0 %vm15_vm0, %v6849_v57 }
 0x103   :  { %4749 = vmatmul.mubr.msk.f32.vlgmr.msra.gmra.mrb[0].mxu1 %vm15_vm0, %v6849_v57  ;;  %5451 = vmatpush3.bf16.xpose.msk.msra.mxu0 %vm6132_vm2, %v6690_v60  ;;  %v1528_v60 = vld [vmem:[#allocation2 + $0x330] sm:$0xff] }
 0x104   :  { %5499 = vmatpush3.bf16.xpose.msk.msra.mxu1 %vm6132_vm2, %v6692_v61  ;;  %5454 = vmatprep.subr.msk.bf16.mxu0 %vm6132_vm2, %v6694_v62  ;;  %v1529_v61 = vld [vmem:[#allocation2 + $0x338] sm:$0xff]  ;;  %v7084_v62 = vpack.c.bf16 %v1497_v50, %v1496_v49  ;;  %v1877_v49 = vld [vmem:[#allocation2 + $0x49] sm:$0xff] }
 0x105   :  { %5502 = vmatprep.subr.msk.bf16.mxu1 %vm6132_vm2, %v6696_v63  ;;  %4782 = vmatprep.mubr.msk.f32.mxu0 %vm15_vm0, %v4144_v53  ;;  %v7086_v63 = vpack.c.bf16 %v1529_v61, %v1528_v60  ;;  %v1894_v57 = vld [vmem:[#allocation2 + $0x111] sm:$0xff]  ;;  %v1909_v60 = vld [vmem:[#allocation2 + $0x1f9] sm:$0xff]  ;;  %v1910_v61 = vld [vmem:[#allocation2 + $0x201] sm:$0xff] }
 0x106   :  { %4816 = vmatprep.mubr.msk.f32.mxu1 %vm15_vm0, %v4144_v53  ;;  %v1878_v50 = vld [vmem:[#allocation2 + $0x51] sm:$0xff] }
 0x10b   :  { %5457 = vmatpush3.bf16.xpose.msk.msra.mxu0 %vm6132_vm2, %v6710_v9  ;;  %v1889_v9 = vld [vmem:[#allocation2 + $0xd9] sm:$0xff] }
 0x10c   :  { %5505 = vmatpush3.bf16.xpose.msk.msra.mxu1 %vm6132_vm2, %v6712_v10  ;;  %5460 = vmatprep.subr.msk.bf16.mxu0 %vm6132_vm2, %v6714_v11  ;;  %v1890_v10 = vld [vmem:[#allocation2 + $0xe1] sm:$0xff]  ;;  %v1921_v11 = vld [vmem:[#allocation2 + $0x289] sm:$0xff] }
 0x10d   :  { %5508 = vmatprep.subr.msk.bf16.mxu1 %vm6132_vm2, %v6716_v12  ;;  %v1922_v12 = vld [vmem:[#allocation2 + $0x291] sm:$0xff] }
 0x113   :  { %5463 = vmatpush3.bf16.xpose.msk.msra.mxu0 %vm6132_vm2, %v6730_v21  ;;  %v5542_v21 = vpack.c.bf16 %v1890_v10, %v1889_v9  ;;  %v1895_v9 = vld [vmem:[#allocation2 + $0x121] sm:$0xff]  ;;  %v1896_v10 = vld [vmem:[#allocation2 + $0x129] sm:$0xff] }
 0x114   :  { %5511 = vmatpush3.bf16.xpose.msk.msra.mxu1 %vm6132_vm2, %v6732_v22  ;;  %5466 = vmatprep.subr.msk.bf16.mxu0 %vm6132_vm2, %v6734_v23  ;;  %v5590_v22 = vpack.c.bf16 %v1922_v12, %v1921_v11  ;;  %v1873_v23 = vld [vmem:[#allocation2 + $0x19] sm:$0xff]  ;;  %v1927_v11 = vld [vmem:[#allocation2 + $0x2d1] sm:$0xff] }
 0x115   :  { %5514 = vmatprep.subr.msk.bf16.mxu1 %vm6132_vm2, %v6736_v24  ;;  %v1874_v24 = vld [vmem:[#allocation2 + $0x21] sm:$0xff]  ;;  %v1928_v12 = vld [vmem:[#allocation2 + $0x2d9] sm:$0xff] }
 0x11b   :  { %5469 = vmatpush3.bf16.xpose.msk.msra.mxu0 %vm6132_vm2, %v6750_v33  ;;  %v1905_v33 = vld [vmem:[#allocation2 + $0x1c9] sm:$0xff] }
 0x11c   :  { %5517 = vmatpush3.bf16.xpose.msk.msra.mxu1 %vm6132_vm2, %v6752_v34  ;;  %5472 = vmatprep.subr.msk.bf16.mxu0 %vm6132_vm2, %v6754_v35  ;;  %v1906_v34 = vld [vmem:[#allocation2 + $0x1d1] sm:$0xff] }
 0x11d   :  { %5520 = vmatprep.subr.msk.bf16.mxu1 %vm6132_vm2, %v6756_v36  ;;  %v1891_v35 = vld [vmem:[#allocation2 + $0xf1] sm:$0xff]  ;;  %v1892_v36 = vld [vmem:[#allocation2 + $0xf9] sm:$0xff] }
 0x123   :  { %5475 = vmatpush3.bf16.xpose.msk.msra.mxu0 %vm6132_vm2, %v6770_v47  ;;  %v1923_v47 = vld [vmem:[#allocation2 + $0x2a1] sm:$0xff] }
 0x124   :  { %5523 = vmatpush3.bf16.xpose.msk.msra.mxu1 %vm6132_vm2, %v6772_v48  ;;  %5478 = vmatprep.subr.msk.bf16.mxu0 %vm6132_vm2, %v6774_v52  ;;  %v1924_v48 = vld [vmem:[#allocation2 + $0x2a9] sm:$0xff]  ;;  %v5545_v52 = vpack.c.bf16 %v1874_v24, %v1873_v23  ;;  %v7159_v23 = vpack.c.bf16 %v1896_v10, %v1895_v9  ;;  %v7161_v24 = vpack.c.bf16 %v1928_v12, %v1927_v11 }
 0x125   :  { %5526 = vmatprep.subr.msk.bf16.mxu1 %vm6132_vm2, %v6776_v54  ;;  %v7110_v54 = vpack.c.bf16 %v1892_v36, %v1891_v35  ;;  %v1911_v35 = vld [vmem:[#allocation2 + $0x211] sm:$0xff]  ;;  %v1912_v36 = vld [vmem:[#allocation2 + $0x219] sm:$0xff] }
 0x12b   :  { %5481 = vmatpush3.bf16.xpose.msk.msra.mxu0 %vm6132_vm2, %v6790_v2  ;;  %v7112_v2 = vpack.c.bf16 %v1924_v48, %v1923_v47  ;;  %v1897_v47 = vld [vmem:[#allocation2 + $0x139] sm:$0xff]  ;;  %v1898_v48 = vld [vmem:[#allocation2 + $0x141] sm:$0xff] }
 0x12c   :  { %5529 = vmatpush3.bf16.xpose.msk.msra.mxu1 %vm6132_vm2, %v6792_v3  ;;  %5484 = vmatprep.subr.msk.bf16.mxu0 %vm6132_vm2, %v6794_v5  ;;  %v1875_v3 = vld [vmem:[#allocation2 + $0x31] sm:$0xff]  ;;  %v1876_v5 = vld [vmem:[#allocation2 + $0x39] sm:$0xff] }
 0x12d   :  { %5532 = vmatprep.subr.msk.bf16.mxu1 %vm6132_vm2, %v6805_v13  ;;  %v1907_v13 = vld [vmem:[#allocation2 + $0x1e1] sm:$0xff]  ;;  %v7135_v26 = vpack.c.bf16 %v1876_v5, %v1875_v3  ;;  %v7177_v5 = vpack.c.bf16 %v1912_v36, %v1911_v35  ;;  %v1916_v36 = vld [vmem:[#allocation2 + $0x249] sm:$0xff] }
 0x12e   :  { %v1915_v35 = vld [vmem:[#allocation2 + $0x241] sm:$0xff] }
 0x133   :  { %5487 = vmatpush3.bf16.xpose.msk.msra.mxu0 %vm6132_vm2, %v6826_v27  ;;  %v1908_v27 = vld [vmem:[#allocation2 + $0x1e9] sm:$0xff] }
 0x134   :  { %5535 = vmatpush3.bf16.xpose.msk.msra.mxu1 %vm6132_vm2, %v6828_v28  ;;  %5490 = vmatprep.subr.msk.bf16.mxu0 %vm6132_vm2, %v7084_v62  ;;  %v1893_v28 = vld [vmem:[#allocation2 + $0x109] sm:$0xff]  ;;  %v7137_v43 = vpack.c.bf16 %v1908_v27, %v1907_v13  ;;  %v7179_v13 = vpack.c.bf16 %v1898_v48, %v1897_v47  ;;  %v1902_v48 = vld [vmem:[#allocation2 + $0x171] sm:$0xff] }
 0x135   :  { %5538 = vmatprep.subr.msk.bf16.mxu1 %vm6132_vm2, %v7086_v63  ;;  %v7139_v44 = vpack.c.bf16 %v1894_v57, %v1893_v28  ;;  %v1881_v28 = vld [vmem:[#allocation2 + $0x79] sm:$0xff]  ;;  %v1882_v57 = vld [vmem:[#allocation2 + $0x81] sm:$0xff]  ;;  %v1901_v47 = vld [vmem:[#allocation2 + $0x169] sm:$0xff] }
 0x136   :  { %v7195_v9 = vpack.c.bf16 %v1882_v57, %v1881_v28  ;;  %v7217_v57 = vpack.c.bf16 %v1916_v36, %v1915_v35  ;;  %v1935_v35 = vld [vmem:[#allocation2 + $0x331] sm:$0xff]  ;;  %v1936_v36 = vld [vmem:[#allocation2 + $0x339] sm:$0xff] }
 0x13b   :  { %5493 = vmatpush3.bf16.xpose.msk.msra.mxu0 %vm6132_vm2, %v6649_v37  ;;  %v5593_v37 = vpack.c.bf16 %v1906_v34, %v1905_v33  ;;  %v1879_v33 = vld [vmem:[#allocation2 + $0x61] sm:$0xff]  ;;  %v1880_v34 = vld [vmem:[#allocation2 + $0x69] sm:$0xff] }
 0x13c   :  { %5541 = vmatpush3.bf16.xpose.msk.msra.mxu1 %vm6132_vm2, %v6651_v38  ;;  %5544 = vmatprep.subr.msk.bf16.mxu0 %vm6132_vm2, %v5542_v21  ;;  %v7118_v38 = vld [vmem:[%s7667_s1 + $0x20] sm:$0xff]  ;;  %v7155_v21 = vpack.c.bf16 %v1878_v50, %v1877_v49  ;;  %v7175_v3 = vpack.c.bf16 %v1880_v34, %v1879_v33  ;;  %v1899_v49 = vld [vmem:[#allocation2 + $0x151] sm:$0xff] }
 0x13d   :  { %5592 = vmatprep.subr.msk.bf16.mxu1 %vm6132_vm2, %v5590_v22  ;;  %v7157_v22 = vpack.c.bf16 %v1910_v61, %v1909_v60  ;;  %v1900_v50 = vld [vmem:[#allocation2 + $0x159] sm:$0xff]  ;;  %v1931_v60 = vld [vmem:[#allocation2 + $0x301] sm:$0xff]  ;;  %v1932_v61 = vld [vmem:[#allocation2 + $0x309] sm:$0xff] }
 0x13e   :  { %v7199_v11 = vpack.c.bf16 %v1900_v50, %v1899_v49  ;;  %v7201_v12 = vpack.c.bf16 %v1932_v61, %v1931_v60  ;;  %v1883_v33 = vld [vmem:[#allocation2 + $0x91] sm:$0xff]  ;;  %v1884_v34 = vld [vmem:[#allocation2 + $0x99] sm:$0xff]  ;;  %v1885_v49 = vld [vmem:[#allocation2 + $0xa9] sm:$0xff] }
 0x13f   :  { %v7215_v28 = vpack.c.bf16 %v1884_v34, %v1883_v33  ;;  %v1886_v50 = vld [vmem:[#allocation2 + $0xb1] sm:$0xff]  ;;  %v1917_v60 = vld [vmem:[#allocation2 + $0x259] sm:$0xff]  ;;  %v1918_v61 = vld [vmem:[#allocation2 + $0x261] sm:$0xff] }
 0x140   :  { %v1903_v33 = vld [vmem:[#allocation2 + $0x181] sm:$0xff]  ;;  %v1904_v34 = vld [vmem:[#allocation2 + $0x189] sm:$0xff] }
 0x142   :  { %4783 = vmatmul.mubr.msk.f32.vlgmr.msra.gmra.mrb[0].mxu0 %vm15_vm0, %v4144_v53 }
 0x143   :  { %4817 = vmatmul.mubr.msk.f32.vlgmr.msra.gmra.mrb[0].mxu1 %vm15_vm0, %v4144_v53  ;;  %5547 = vmatpush3.bf16.xpose.msk.msra.mxu0 %vm6132_vm2, %v5545_v52  ;;  %v7141_v53 = vpack.c.bf16 %v1926_v25, %v1925_v58  ;;  %v1929_v52 = vld [vmem:[#allocation2 + $0x2e9] sm:$0xff]  ;;  %v1914_v25 = vld [vmem:[#allocation2 + $0x231] sm:$0xff] }
 0x144   :  { %5595 = vmatpush3.bf16.xpose.msk.msra.mxu1 %vm6132_vm2, %v5593_v37  ;;  %5550 = vmatprep.subr.msk.bf16.mxu0 %vm6132_vm2, %v7110_v54  ;;  %v1930_v37 = vld [vmem:[#allocation2 + $0x2f1] sm:$0xff]  ;;  %v1913_v58 = vld [vmem:[#allocation2 + $0x229] sm:$0xff] }
 0x145   :  { %5598 = vmatprep.subr.msk.bf16.mxu1 %vm6132_vm2, %v7112_v2  ;;  %4850 = vmatprep.mubr.msk.f32.mxu0 %vm15_vm0, %v7118_v38  ;;  %v7181_v27 = vpack.c.bf16 %v1930_v37, %v1929_v52  ;;  %v7197_v10 = vpack.c.bf16 %v1914_v25, %v1913_v58  ;;  %v1933_v52 = vld [vmem:[#allocation2 + $0x319] sm:$0xff]  ;;  %v1934_v37 = vld [vmem:[#allocation2 + $0x321] sm:$0xff]  ;;  %v7219_v58 = vpack.c.bf16 %v1902_v48, %v1901_v47 }
 0x146   :  { %4884 = vmatprep.mubr.msk.f32.mxu1 %vm15_vm0, %v7118_v38  ;;  %v7221_v25 = vpack.c.bf16 %v1934_v37, %v1933_v52  ;;  %v7235_v47 = vpack.c.bf16 %v1886_v50, %v1885_v49  ;;  %v7237_v48 = vpack.c.bf16 %v1918_v61, %v1917_v60  ;;  %v7239_v52 = vpack.c.bf16 %v1904_v34, %v1903_v33  ;;  %v1887_v49 = vld [vmem:[#allocation2 + $0xc1] sm:$0xff]  ;;  %v1888_v50 = vld [vmem:[#allocation2 + $0xc9] sm:$0xff]  ;;  %v1919_v60 = vld [vmem:[#allocation2 + $0x271] sm:$0xff] }
 0x147   :  { %v7241_v37 = vpack.c.bf16 %v1936_v36, %v1935_v35  ;;  %v1920_v61 = vld [vmem:[#allocation2 + $0x279] sm:$0xff]  ;;  %v7255_v33 = vpack.c.bf16 %v1888_v50, %v1887_v49  ;;  %v7276_v35 = vld [vmem:[%s7667_s1 + $0x28] sm:$0xff] }
 0x148   :  { %v7257_v34 = vpack.c.bf16 %v1920_v61, %v1919_v60  ;;  %v2739_v36 = vld [vmem:[#allocation2 + $0x2c0] sm:$0xff] }
 0x14b   :  { %5553 = vmatpush3.bf16.xpose.msk.msra.mxu0 %vm6132_vm2, %v7135_v26 }
 0x14c   :  { %5601 = vmatpush3.bf16.xpose.msk.msra.mxu1 %vm6132_vm2, %v7137_v43  ;;  %5556 = vmatprep.subr.msk.bf16.mxu0 %vm6132_vm2, %v7139_v44 }
 0x14d   :  { %5604 = vmatprep.subr.msk.bf16.mxu1 %vm6132_vm2, %v7141_v53 }
 0x153   :  { %5559 = vmatpush3.bf16.xpose.msk.msra.mxu0 %vm6132_vm2, %v7155_v21 }
 0x154   :  { %5607 = vmatpush3.bf16.xpose.msk.msra.mxu1 %vm6132_vm2, %v7157_v22  ;;  %5562 = vmatprep.subr.msk.bf16.mxu0 %vm6132_vm2, %v7159_v23 }
 0x155   :  { %5610 = vmatprep.subr.msk.bf16.mxu1 %vm6132_vm2, %v7161_v24 }
 0x15b   :  { %5565 = vmatpush3.bf16.xpose.msk.msra.mxu0 %vm6132_vm2, %v7175_v3 }
 0x15c   :  { %5613 = vmatpush3.bf16.xpose.msk.msra.mxu1 %vm6132_vm2, %v7177_v5  ;;  %5568 = vmatprep.subr.msk.bf16.mxu0 %vm6132_vm2, %v7179_v13 }
 0x15d   :  { %5616 = vmatprep.subr.msk.bf16.mxu1 %vm6132_vm2, %v7181_v27 }
 0x163   :  { %5571 = vmatpush3.bf16.xpose.msk.msra.mxu0 %vm6132_vm2, %v7195_v9 }
 0x164   :  { %5619 = vmatpush3.bf16.xpose.msk.msra.mxu1 %vm6132_vm2, %v7197_v10  ;;  %5574 = vmatprep.subr.msk.bf16.mxu0 %vm6132_vm2, %v7199_v11 }
 0x165   :  { %5622 = vmatprep.subr.msk.bf16.mxu1 %vm6132_vm2, %v7201_v12 }
 0x16b   :  { %5577 = vmatpush3.bf16.xpose.msk.msra.mxu0 %vm6132_vm2, %v7215_v28 }
 0x16c   :  { %5625 = vmatpush3.bf16.xpose.msk.msra.mxu1 %vm6132_vm2, %v7217_v57  ;;  %5580 = vmatprep.subr.msk.bf16.mxu0 %vm6132_vm2, %v7219_v58 }
 0x16d   :  { %5628 = vmatprep.subr.msk.bf16.mxu1 %vm6132_vm2, %v7221_v25 }
 0x173   :  { %5583 = vmatpush3.bf16.xpose.msk.msra.mxu0 %vm6132_vm2, %v7235_v47 }
 0x174   :  { %5631 = vmatpush3.bf16.xpose.msk.msra.mxu1 %vm6132_vm2, %v7237_v48  ;;  %5586 = vmatprep.subr.msk.bf16.mxu0 %vm6132_vm2, %v7239_v52 }
 0x175   :  { %5634 = vmatprep.subr.msk.bf16.mxu1 %vm6132_vm2, %v7241_v37 }
 0x17b   :  { %5589 = vmatpush3.bf16.xpose.msk.msra.mxu0 %vm6132_vm2, %v7255_v33 }
 0x17c   :  { %5637 = vmatpush3.bf16.xpose.msk.msra.mxu1 %vm6132_vm2, %v7257_v34  ;;  %5640 = vmatprep.subr.msk.bf16.mxu0 %vm6132_vm2, %v6840_v55  ;;  %v7676_v55 = vld [vmem:[#allocation6_spill] sm:$0xff] }
 0x17d   :  { %5688 = vmatprep.subr.msk.bf16.mxu1 %vm6132_vm2, %v6842_v56  ;;  %v7677_v56 = vld [vmem:[#allocation7_spill] sm:$0xff] }
 0x182   :  { %4851 = vmatmul.mubr.msk.f32.vlgmr.msra.gmra.mrb[0].mxu0 %vm15_vm0, %v7118_v38 }
 0x183   :  { %4885 = vmatmul.mubr.msk.f32.vlgmr.msra.gmra.mrb[0].mxu1 %vm15_vm0, %v7118_v38  ;;  %5643 = vmatpush3.bf16.xpose.msk.msra.mxu0 %vm6132_vm2, %v6867_v8  ;;  %v2310_v8 = vld [vmem:[#allocation2 + $0x182] sm:$0xff]  ;;  %v2738_v38 = vld [vmem:[#allocation2 + $0x2b8] sm:$0xff] }
 0x184   :  { %5691 = vmatpush3.bf16.xpose.msk.msra.mxu1 %vm6132_vm2, %v6869_v14  ;;  %5646 = vmatprep.subr.msk.bf16.mxu0 %vm6132_vm2, %v6871_v15  ;;  %v2311_v14 = vld [vmem:[#allocation2 + $0x18a] sm:$0xff]  ;;  %v2342_v15 = vld [vmem:[#allocation2 + $0x332] sm:$0xff]  ;;  %v5788_v61 = vpack.c.bf16 %v2739_v36, %v2738_v38 }
 0x185   :  { %5694 = vmatprep.subr.msk.bf16.mxu1 %vm6132_vm2, %v6873_v16  ;;  %4918 = vmatprep.mubr.msk.f32.mxu0 %vm15_vm0, %v7276_v35  ;;  %v2343_v16 = vld [vmem:[#allocation2 + $0x33a] sm:$0xff] }
 0x186   :  { %4952 = vmatprep.mubr.msk.f32.mxu1 %vm15_vm0, %v7276_v35 }
 0x18b   :  { %5649 = vmatpush3.bf16.xpose.msk.msra.mxu0 %vm6132_vm2, %v6887_v31  ;;  %v7356_v31 = vpack.c.bf16 %v2311_v14, %v2310_v8  ;;  %v2691_v8 = vld [vmem:[#allocation2 + $0x50] sm:$0xff]  ;;  %v2722_v14 = vld [vmem:[#allocation2 + $0x1f8] sm:$0xff] }
 0x18c   :  { %5697 = vmatpush3.bf16.xpose.msk.msra.mxu1 %vm6132_vm2, %v6889_v32  ;;  %5652 = vmatprep.subr.msk.bf16.mxu0 %vm6132_vm2, %v6891_v39  ;;  %v7358_v32 = vpack.c.bf16 %v2343_v16, %v2342_v15  ;;  %v2294_v39 = vld [vmem:[#allocation2 + $0xc2] sm:$0xff] }
 0x18d   :  { %5700 = vmatprep.subr.msk.bf16.mxu1 %vm6132_vm2, %v6893_v40  ;;  %v2295_v40 = vld [vmem:[#allocation2 + $0xca] sm:$0xff]  ;;  %v2723_v15 = vld [vmem:[#allocation2 + $0x200] sm:$0xff] }
 0x18e   :  { %v2708_v16 = vld [vmem:[#allocation2 + $0x120] sm:$0xff] }
 0x193   :  { %5655 = vmatpush3.bf16.xpose.msk.msra.mxu0 %vm6132_vm2, %v6907_v59  ;;  %v2326_v59 = vld [vmem:[#allocation2 + $0x272] sm:$0xff] }
 0x194   :  { %5703 = vmatpush3.bf16.xpose.msk.msra.mxu1 %vm6132_vm2, %v6909_v0  ;;  %5658 = vmatprep.subr.msk.bf16.mxu0 %vm6132_vm2, %v6911_v1  ;;  %v2327_v0 = vld [vmem:[#allocation2 + $0x27a] sm:$0xff]  ;;  %v2704_v1 = vld [vmem:[#allocation2 + $0xf0] sm:$0xff] }
 0x195   :  { %5706 = vmatprep.subr.msk.bf16.mxu1 %vm6132_vm2, %v6913_v51  ;;  %v2705_v51 = vld [vmem:[#allocation2 + $0xf8] sm:$0xff] }
 0x19b   :  { %5661 = vmatpush3.bf16.xpose.msk.msra.mxu0 %vm6132_vm2, %v6927_v29  ;;  %v2736_v29 = vld [vmem:[#allocation2 + $0x2a0] sm:$0xff] }
 0x19c   :  { %5709 = vmatpush3.bf16.xpose.msk.msra.mxu1 %vm6132_vm2, %v6929_v30  ;;  %5664 = vmatprep.subr.msk.bf16.mxu0 %vm6132_vm2, %v6931_v41  ;;  %v2737_v30 = vld [vmem:[#allocation2 + $0x2a8] sm:$0xff]  ;;  %v7372_v41 = vpack.c.bf16 %v2295_v40, %v2294_v39  ;;  %v2741_v40 = vld [vmem:[#allocation2 + $0x2d8] sm:$0xff] }
 0x19d   :  { %5712 = vmatprep.subr.msk.bf16.mxu1 %vm6132_vm2, %v6933_v42  ;;  %v7374_v42 = vpack.c.bf16 %v2327_v0, %v2326_v59  ;;  %v2709_v39 = vld [vmem:[#allocation2 + $0x128] sm:$0xff]  ;;  %v5791_v0 = vpack.c.bf16 %v2723_v15, %v2722_v14  ;;  %v2744_v14 = vld [vmem:[#allocation2 + $0x300] sm:$0xff] }
 0x19e   :  { %v2745_v15 = vld [vmem:[#allocation2 + $0x308] sm:$0xff] }
 0x1a3   :  { %5667 = vmatpush3.bf16.xpose.msk.msra.mxu0 %vm6132_vm2, %v7676_v55  ;;  %v7391_v55 = vld [vmem:[%s7667_s1 + $0x30] sm:$0xff] }
 0x1a4   :  { %5715 = vmatpush3.bf16.xpose.msk.msra.mxu1 %vm6132_vm2, %v7677_v56  ;;  %5670 = vmatprep.subr.msk.bf16.mxu0 %vm6132_vm2, %v6951_v19  ;;  %v2688_v19 = vld [vmem:[#allocation2 + $0x30] sm:$0xff]  ;;  %v2690_v56 = vld [vmem:[#allocation2 + $0x48] sm:$0xff] }
 0x1a5   :  { %5718 = vmatprep.subr.msk.bf16.mxu1 %vm6132_vm2, %v6953_v20  ;;  %v2689_v20 = vld [vmem:[#allocation2 + $0x38] sm:$0xff]  ;;  %v5743_v59 = vpack.c.bf16 %v2691_v8, %v2690_v56  ;;  %v2712_v56 = vld [vmem:[#allocation2 + $0x150] sm:$0xff] }
 0x1a6   :  { %v5737_v49 = vpack.c.bf16 %v2689_v20, %v2688_v19  ;;  %v2710_v19 = vld [vmem:[#allocation2 + $0x138] sm:$0xff]  ;;  %v2711_v20 = vld [vmem:[#allocation2 + $0x140] sm:$0xff] }
 0x1a7   :  { %v5752_v38 = vpack.c.bf16 %v2711_v20, %v2710_v19  ;;  %v2713_v8 = vld [vmem:[#allocation2 + $0x158] sm:$0xff] }
 0x1ab   :  { %5673 = vmatpush3.bf16.xpose.msk.msra.mxu0 %vm6132_vm2, %v6967_v6  ;;  %v2720_v6 = vld [vmem:[#allocation2 + $0x1e0] sm:$0xff] }
 0x1ac   :  { %5721 = vmatpush3.bf16.xpose.msk.msra.mxu1 %vm6132_vm2, %v6969_v7  ;;  %5676 = vmatprep.subr.msk.bf16.mxu0 %vm6132_vm2, %v6971_v18  ;;  %v5782_v18 = vpack.c.bf16 %v2737_v30, %v2736_v29  ;;  %v2721_v7 = vld [vmem:[#allocation2 + $0x1e8] sm:$0xff]  ;;  %v2692_v29 = vld [vmem:[#allocation2 + $0x60] sm:$0xff] }
 0x1ad   :  { %5724 = vmatprep.subr.msk.bf16.mxu1 %vm6132_vm2, %v6973_v17  ;;  %v5734_v17 = vpack.c.bf16 %v2705_v51, %v2704_v1  ;;  %v5785_v50 = vpack.c.bf16 %v2721_v7, %v2720_v6  ;;  %v5746_v1 = vpack.c.bf16 %v2709_v39, %v2708_v16  ;;  %v2693_v30 = vld [vmem:[#allocation2 + $0x68] sm:$0xff]  ;;  %v2743_v7 = vld [vmem:[#allocation2 + $0x2f0] sm:$0xff] }
 0x1ae   :  { %v2742_v6 = vld [vmem:[#allocation2 + $0x2e8] sm:$0xff] }
 0x1af   :  { %v5800_v36 = vpack.c.bf16 %v2743_v7, %v2742_v6 }
 0x1b3   :  { %5679 = vmatpush3.bf16.xpose.msk.msra.mxu0 %vm6132_vm2, %v6987_v45  ;;  %v2706_v45 = vld [vmem:[#allocation2 + $0x108] sm:$0xff] }
 0x1b4   :  { %5727 = vmatpush3.bf16.xpose.msk.msra.mxu1 %vm6132_vm2, %v6989_v46  ;;  %5682 = vmatprep.subr.msk.bf16.mxu0 %vm6132_vm2, %v7356_v31  ;;  %v2707_v46 = vld [vmem:[#allocation2 + $0x110] sm:$0xff] }
 0x1b5   :  { %5730 = vmatprep.subr.msk.bf16.mxu1 %vm6132_vm2, %v7358_v32  ;;  %v5740_v60 = vpack.c.bf16 %v2707_v46, %v2706_v45  ;;  %v5749_v45 = vpack.c.bf16 %v2693_v30, %v2692_v29  ;;  %v2714_v29 = vld [vmem:[#allocation2 + $0x168] sm:$0xff]  ;;  %v2715_v30 = vld [vmem:[#allocation2 + $0x170] sm:$0xff] }
 0x1b6   :  { %v5764_v6 = vpack.c.bf16 %v2715_v30, %v2714_v29 }
 0x1bb   :  { %5685 = vmatpush3.bf16.xpose.msk.msra.mxu0 %vm6132_vm2, %v7372_v41 }
 0x1bc   :  { %5733 = vmatpush3.bf16.xpose.msk.msra.mxu1 %vm6132_vm2, %v7374_v42  ;;  %5736 = vmatprep.subr.msk.bf16.mxu0 %vm6132_vm2, %v5734_v17  ;;  %v2724_v17 = vld [vmem:[#allocation2 + $0x210] sm:$0xff] }
 0x1bd   :  { %5784 = vmatprep.subr.msk.bf16.mxu1 %vm6132_vm2, %v5782_v18  ;;  %v2725_v18 = vld [vmem:[#allocation2 + $0x218] sm:$0xff] }
 0x1be   :  { %v5797_v46 = vpack.c.bf16 %v2725_v18, %v2724_v17  ;;  %v2746_v17 = vld [vmem:[#allocation2 + $0x318] sm:$0xff]  ;;  %v2747_v18 = vld [vmem:[#allocation2 + $0x320] sm:$0xff] }
 0x1bf   :  { %v5812_v7 = vpack.c.bf16 %v2747_v18, %v2746_v17  ;;  %v7472_v17 = vld [vmem:[%s7667_s1 + $0x38] sm:$0xff] }
 0x1c2   :  { %4919 = vmatmul.mubr.msk.f32.vlgmr.msra.gmra.mrb[0].mxu0 %vm15_vm0, %v7276_v35 }
 0x1c3   :  { %4953 = vmatmul.mubr.msk.f32.vlgmr.msra.gmra.mrb[0].mxu1 %vm15_vm0, %v7276_v35  ;;  %5739 = vmatpush3.bf16.xpose.msk.msra.mxu0 %vm6132_vm2, %v5737_v49  ;;  %v2740_v35 = vld [vmem:[#allocation2 + $0x2d0] sm:$0xff]  ;;  %v2694_v49 = vld [vmem:[#allocation2 + $0x78] sm:$0xff] }
 0x1c4   :  { %5787 = vmatpush3.bf16.xpose.msk.msra.mxu1 %vm6132_vm2, %v5785_v50  ;;  %5742 = vmatprep.subr.msk.bf16.mxu0 %vm6132_vm2, %v5740_v60  ;;  %v5794_v51 = vpack.c.bf16 %v2741_v40, %v2740_v35  ;;  %v2695_v50 = vld [vmem:[#allocation2 + $0x80] sm:$0xff]  ;;  %v2726_v60 = vld [vmem:[#allocation2 + $0x228] sm:$0xff]  ;;  %v5758_v35 = vpack.c.bf16 %v2713_v8, %v2712_v56  ;;  %v5806_v40 = vpack.c.bf16 %v2745_v15, %v2744_v14  ;;  %v2732_v56 = vld [vmem:[#allocation2 + $0x270] sm:$0xff] }
 0x1c5   :  { %5790 = vmatprep.subr.msk.bf16.mxu1 %vm6132_vm2, %v5788_v61  ;;  %4986 = vmatprep.mubr.msk.f32.mxu0 %vm15_vm0, %v7391_v55  ;;  %v2727_v61 = vld [vmem:[#allocation2 + $0x230] sm:$0xff]  ;;  %v5755_v16 = vpack.c.bf16 %v2695_v50, %v2694_v49  ;;  %v2733_v8 = vld [vmem:[#allocation2 + $0x278] sm:$0xff]  ;;  %v2719_v15 = vld [vmem:[#allocation2 + $0x1a0] sm:$0xff] }
 0x1c6   :  { %5020 = vmatprep.mubr.msk.f32.mxu1 %vm15_vm0, %v7391_v55  ;;  %v5803_v39 = vpack.c.bf16 %v2727_v61, %v2726_v60  ;;  %v2700_v60 = vld [vmem:[#allocation2 + $0xc0] sm:$0xff]  ;;  %v2701_v61 = vld [vmem:[#allocation2 + $0xc8] sm:$0xff]  ;;  %v2718_v14 = vld [vmem:[#allocation2 + $0x198] sm:$0xff] }
 0x1cb   :  { %5745 = vmatpush3.bf16.xpose.msk.msra.mxu0 %vm6132_vm2, %v5743_v59  ;;  %v2696_v59 = vld [vmem:[#allocation2 + $0x90] sm:$0xff] }
 0x1cc   :  { %5793 = vmatpush3.bf16.xpose.msk.msra.mxu1 %vm6132_vm2, %v5791_v0  ;;  %5748 = vmatprep.subr.msk.bf16.mxu0 %vm6132_vm2, %v5746_v1  ;;  %v2697_v0 = vld [vmem:[#allocation2 + $0x98] sm:$0xff]  ;;  %v2728_v1 = vld [vmem:[#allocation2 + $0x240] sm:$0xff] }
 0x1cd   :  { %5796 = vmatprep.subr.msk.bf16.mxu1 %vm6132_vm2, %v5794_v51  ;;  %v2729_v51 = vld [vmem:[#allocation2 + $0x248] sm:$0xff]  ;;  %v5761_v19 = vpack.c.bf16 %v2697_v0, %v2696_v59  ;;  %v5776_v59 = vpack.c.bf16 %v2719_v15, %v2718_v14 }
 0x1ce   :  { %v5809_v20 = vpack.c.bf16 %v2729_v51, %v2728_v1  ;;  %v2734_v1 = vld [vmem:[#allocation2 + $0x288] sm:$0xff]  ;;  %v2735_v51 = vld [vmem:[#allocation2 + $0x290] sm:$0xff] }
 0x1cf   :  { %v5827_v30 = vpack.c.bf16 %v2735_v51, %v2734_v1  ;;  %v3506_v15 = vld [vmem:[#allocation2 + $0x62] sm:$0xff] }
 0x1d3   :  { %5751 = vmatpush3.bf16.xpose.msk.msra.mxu0 %vm6132_vm2, %v5749_v45  ;;  %v2698_v45 = vld [vmem:[#allocation2 + $0xa8] sm:$0xff] }
 0x1d4   :  { %5799 = vmatpush3.bf16.xpose.msk.msra.mxu1 %vm6132_vm2, %v5797_v46  ;;  %5754 = vmatprep.subr.msk.bf16.mxu0 %vm6132_vm2, %v5752_v38  ;;  %v2699_v46 = vld [vmem:[#allocation2 + $0xb0] sm:$0xff]  ;;  %v2730_v38 = vld [vmem:[#allocation2 + $0x258] sm:$0xff] }
 0x1d5   :  { %5802 = vmatprep.subr.msk.bf16.mxu1 %vm6132_vm2, %v5800_v36  ;;  %v2731_v36 = vld [vmem:[#allocation2 + $0x260] sm:$0xff]  ;;  %v5767_v49 = vpack.c.bf16 %v2699_v46, %v2698_v45  ;;  %v3505_v45 = vld [vmem:[#allocation2 + $0x52] sm:$0xff] }
 0x1d6   :  { %v5815_v50 = vpack.c.bf16 %v2731_v36, %v2730_v38  ;;  %v3536_v46 = vld [vmem:[#allocation2 + $0x1fa] sm:$0xff]  ;;  %v3537_v38 = vld [vmem:[#allocation2 + $0x202] sm:$0xff] }
 0x1d7   :  { %v3522_v36 = vld [vmem:[#allocation2 + $0x122] sm:$0xff] }
 0x1db   :  { %5757 = vmatpush3.bf16.xpose.msk.msra.mxu0 %vm6132_vm2, %v5755_v16  ;;  %v2750_v16 = vld [vmem:[#allocation2 + $0x348] sm:$0xff] }
 0x1dc   :  { %5805 = vmatpush3.bf16.xpose.msk.msra.mxu1 %vm6132_vm2, %v5803_v39  ;;  %5760 = vmatprep.subr.msk.bf16.mxu0 %vm6132_vm2, %v5758_v35  ;;  %v2751_v39 = vld [vmem:[#allocation2 + $0x350] sm:$0xff]  ;;  %v5773_v35 = vpack.c.bf16 %v2701_v61, %v2700_v60  ;;  %v3555_v60 = vld [vmem:[#allocation2 + $0x2da] sm:$0xff] }
 0x1dd   :  { %5808 = vmatprep.subr.msk.bf16.mxu1 %vm6132_vm2, %v5806_v40  ;;  %v5821_v40 = vpack.c.bf16 %v2733_v8, %v2732_v56  ;;  %v5824_v0 = vpack.c.bf16 %v2751_v39, %v2750_v16  ;;  %v5983_v56 = vpack.c.bf16 %v3537_v38, %v3536_v46  ;;  %v3507_v16 = vld [vmem:[#allocation2 + $0x6a] sm:$0xff]  ;;  %v3538_v39 = vld [vmem:[#allocation2 + $0x212] sm:$0xff]  ;;  %v3517_v46 = vld [vmem:[#allocation2 + $0xe2] sm:$0xff] }
 0x1de   :  { %v3549_v38 = vld [vmem:[#allocation2 + $0x292] sm:$0xff] }
 0x1e3   :  { %5763 = vmatpush3.bf16.xpose.msk.msra.mxu0 %vm6132_vm2, %v5761_v19 }
 0x1e4   :  { %5811 = vmatpush3.bf16.xpose.msk.msra.mxu1 %vm6132_vm2, %v5809_v20  ;;  %5766 = vmatprep.subr.msk.bf16.mxu0 %vm6132_vm2, %v5764_v6  ;;  %v7578_v6 = vld [vmem:[%s7667_s1 + $0x40] sm:$0xff]  ;;  %s6086_s1 = smov [#allocation3]  }
 0x1e5   :  { %5814 = vmatprep.subr.msk.bf16.mxu1 %vm6132_vm2, %v5812_v7  ;;  %v3504_v7 = vld [vmem:[#allocation2 + $0x4a] sm:$0xff]  ;;  %s3933_s23 = sshll.u32 %s6086_s1, 4  ;;  %s3934_s23 = int_to_ptr.vmem [resolvable:$true] %s3933_s23 }
 0x1e6   :  { %v5935_v61 = vpack.c.bf16 %v3505_v45, %v3504_v7  ;;  %s6060_s24 = scalar_lea.vmem %s3934_s23, 512  ;;  %p6065_p1 = scmp.lt.s32.totalorder %s3934_s23, %s3934_s23 }
 0x1e7   :  { %p6061_p0 = scmp.ne.s32.totalorder %s3934_s23, %s6060_s24  ;;  %p6066_p2 = scmp.lt.s32.totalorder %s6060_s24, %s6060_s24 }
 0x1e9   :  { %p6067_p3 = por %p6066_p2, %p6065_p1 }
 0x1eb   :  { %5769 = vmatpush3.bf16.xpose.msk.msra.mxu0 %vm6132_vm2, %v5767_v49  ;;  %v3523_v49 = vld [vmem:[#allocation2 + $0x12a] sm:$0xff]  ;;  %p6068_p4 = pnand %p6067_p3, %p6061_p0 }
 0x1ec   :  { %5817 = vmatpush3.bf16.xpose.msk.msra.mxu1 %vm6132_vm2, %v5815_v50  ;;  %5772 = vmatprep.subr.msk.bf16.mxu0 %vm6132_vm2, %v7084_v62  ;;  %v2702_v62 = vld [vmem:[#allocation2 + $0xd8] sm:$0xff]  ;;  %v5938_v8 = vpack.c.bf16 %v3523_v49, %v3522_v36 }
 0x1ed   :  { %5820 = vmatprep.subr.msk.bf16.mxu1 %vm6132_vm2, %v7086_v63  ;;  %v2703_v63 = vld [vmem:[#allocation2 + $0xe0] sm:$0xff]  ;;  %v3554_v50 = vld [vmem:[#allocation2 + $0x2d2] sm:$0xff] }
 0x1ee   :  { %v5779_v29 = vpack.c.bf16 %v2703_v63, %v2702_v62  ;;  %v5986_v14 = vpack.c.bf16 %v3555_v60, %v3554_v50  ;;  %v3557_v62 = vld [vmem:[#allocation2 + $0x2f2] sm:$0xff]  ;;  %v5941_v63 = vpack.c.bf16 %v3507_v16, %v3506_v15 }
 0x1f3   :  { %5775 = vmatpush3.bf16.xpose.msk.msra.mxu0 %vm6132_vm2, %v5773_v35  ;;  %v3539_v35 = vld [vmem:[#allocation2 + $0x21a] sm:$0xff] }
 0x1f4   :  { %5823 = vmatpush3.bf16.xpose.msk.msra.mxu1 %vm6132_vm2, %v5821_v40  ;;  %5778 = vmatprep.subr.msk.bf16.mxu0 %vm6132_vm2, %v5776_v59  ;;  %v3524_v40 = vld [vmem:[#allocation2 + $0x13a] sm:$0xff]  ;;  %v3525_v59 = vld [vmem:[#allocation2 + $0x142] sm:$0xff]  ;;  %v5989_v1 = vpack.c.bf16 %v3539_v35, %v3538_v39 }
 0x1f5   :  { %5826 = vmatprep.subr.msk.bf16.mxu1 %vm6132_vm2, %v5824_v0  ;;  %v3556_v0 = vld [vmem:[#allocation2 + $0x2ea] sm:$0xff]  ;;  %v5944_v51 = vpack.c.bf16 %v3525_v59, %v3524_v40 }
 0x1fb   :  { %5781 = vmatpush3.bf16.xpose.msk.msra.mxu0 %vm6132_vm2, %v5779_v29  ;;  %v5992_v29 = vpack.c.bf16 %v3557_v62, %v3556_v0 }
 0x1fc   :  { %5829 = vmatpush3.bf16.xpose.msk.msra.mxu1 %vm6132_vm2, %v5827_v30  ;;  %5832 = vmatprep.subr.msk.bf16.mxu0 %vm6132_vm2, %v7110_v54  ;;  %v3909_v54 = vld [vmem:[%s7668_s2] sm:$0xff] }
 0x1fd   :  { %5880 = vmatprep.subr.msk.bf16.mxu1 %vm6132_vm2, %v7112_v2  ;;  %v6085_v2 = vmov 0   ;;  %v3508_v30 = vld [vmem:[#allocation2 + $0x7a] sm:$0xff] }
 0x1fe   :  { %6059 = vset.pattern.permute.xlu0 %v6085_v2  ;;  %v3541_v2 = vld [vmem:[#allocation2 + $0x232] sm:$0xff] }
 0x1ff   :  { %3912 = vperm.xlu0 %6059, %v3909_v54   ;;  %v3540_v54 = vld [vmem:[#allocation2 + $0x22a] sm:$0xff] }
 0x202   :  { %4987 = vmatmul.mubr.msk.f32.vlgmr.msra.gmra.mrb[0].mxu0 %vm15_vm0, %v7391_v55 }
 0x203   :  { %5021 = vmatmul.mubr.msk.f32.vlgmr.msra.gmra.mrb[0].mxu1 %vm15_vm0, %v7391_v55  ;;  %5835 = vmatpush3.bf16.xpose.msk.msra.mxu0 %vm6132_vm2, %v7135_v26  ;;  %v3125_v26 = vld [vmem:[#allocation2 + $0x199] sm:$0xff] }
 0x204   :  { %5883 = vmatpush3.bf16.xpose.msk.msra.mxu1 %vm6132_vm2, %v7137_v43  ;;  %5838 = vmatprep.subr.msk.bf16.mxu0 %vm6132_vm2, %v7139_v44  ;;  %v3126_v43 = vld [vmem:[#allocation2 + $0x1a1] sm:$0xff]  ;;  %v3157_v44 = vld [vmem:[#allocation2 + $0x349] sm:$0xff] }
 0x205   :  { %5886 = vmatprep.subr.msk.bf16.mxu1 %vm6132_vm2, %v7141_v53  ;;  %5054 = vmatprep.mubr.msk.f32.mxu0 %vm15_vm0, %v7472_v17  ;;  %v3158_v53 = vld [vmem:[#allocation2 + $0x351] sm:$0xff] }
 0x206   :  { %5088 = vmatprep.mubr.msk.f32.mxu1 %vm15_vm0, %v7472_v17 }
 0x20b   :  { %5841 = vmatpush3.bf16.xpose.msk.msra.mxu0 %vm6132_vm2, %v7155_v21  ;;  %v5872_v21 = vpack.c.bf16 %v3126_v43, %v3125_v26  ;;  %v3526_v26 = vld [vmem:[#allocation2 + $0x152] sm:$0xff]  ;;  %v3527_v43 = vld [vmem:[#allocation2 + $0x15a] sm:$0xff] }
 0x20c   :  { %5889 = vmatpush3.bf16.xpose.msk.msra.mxu1 %vm6132_vm2, %v7157_v22  ;;  %5844 = vmatprep.subr.msk.bf16.mxu0 %vm6132_vm2, %v7159_v23  ;;  %v5920_v22 = vpack.c.bf16 %v3158_v53, %v3157_v44  ;;  %v3109_v23 = vld [vmem:[#allocation2 + $0xd9] sm:$0xff]  ;;  %v3558_v44 = vld [vmem:[#allocation2 + $0x302] sm:$0xff]  ;;  %v3559_v53 = vld [vmem:[#allocation2 + $0x30a] sm:$0xff] }
 0x20d   :  { %5892 = vmatprep.subr.msk.bf16.mxu1 %vm6132_vm2, %v7161_v24  ;;  %v3110_v24 = vld [vmem:[#allocation2 + $0xe1] sm:$0xff] }
 0x213   :  { %5847 = vmatpush3.bf16.xpose.msk.msra.mxu0 %vm6132_vm2, %v7175_v3  ;;  %v3141_v3 = vld [vmem:[#allocation2 + $0x289] sm:$0xff] }
 0x214   :  { %5895 = vmatpush3.bf16.xpose.msk.msra.mxu1 %vm6132_vm2, %v7177_v5  ;;  %5850 = vmatprep.subr.msk.bf16.mxu0 %vm6132_vm2, %v7179_v13  ;;  %v3142_v5 = vld [vmem:[#allocation2 + $0x291] sm:$0xff] }
 0x215   :  { %5898 = vmatprep.subr.msk.bf16.mxu1 %vm6132_vm2, %v7181_v27  ;;  %v3518_v13 = vld [vmem:[#allocation2 + $0xf2] sm:$0xff]  ;;  %v3519_v27 = vld [vmem:[#allocation2 + $0xfa] sm:$0xff] }
 0x21b   :  { %5853 = vmatpush3.bf16.xpose.msk.msra.mxu0 %vm6132_vm2, %v7195_v9  ;;  %v3550_v9 = vld [vmem:[#allocation2 + $0x2a2] sm:$0xff] }
 0x21c   :  { %5901 = vmatpush3.bf16.xpose.msk.msra.mxu1 %vm6132_vm2, %v7197_v10  ;;  %5856 = vmatprep.subr.msk.bf16.mxu0 %vm6132_vm2, %v7199_v11  ;;  %v3551_v10 = vld [vmem:[#allocation2 + $0x2aa] sm:$0xff]  ;;  %v5875_v11 = vpack.c.bf16 %v3110_v24, %v3109_v23  ;;  %v5950_v23 = vpack.c.bf16 %v3527_v43, %v3526_v26  ;;  %v5998_v24 = vpack.c.bf16 %v3559_v53, %v3558_v44 }
 0x21d   :  { %5904 = vmatprep.subr.msk.bf16.mxu1 %vm6132_vm2, %v7201_v12  ;;  %v5923_v12 = vpack.c.bf16 %v3142_v5, %v3141_v3  ;;  %v3510_v3 = vld [vmem:[#allocation2 + $0x92] sm:$0xff]  ;;  %v3511_v5 = vld [vmem:[#allocation2 + $0x9a] sm:$0xff] }
 0x223   :  { %5859 = vmatpush3.bf16.xpose.msk.msra.mxu0 %vm6132_vm2, %v7215_v28  ;;  %v5926_v28 = vpack.c.bf16 %v3519_v27, %v3518_v13  ;;  %v3542_v13 = vld [vmem:[#allocation2 + $0x242] sm:$0xff]  ;;  %v3543_v27 = vld [vmem:[#allocation2 + $0x24a] sm:$0xff] }
 0x224   :  { %5907 = vmatpush3.bf16.xpose.msk.msra.mxu1 %vm6132_vm2, %v7217_v57  ;;  %5862 = vmatprep.subr.msk.bf16.mxu0 %vm6132_vm2, %v7219_v58  ;;  %v5974_v57 = vpack.c.bf16 %v3551_v10, %v3550_v9  ;;  %v3502_v58 = vld [vmem:[#allocation2 + $0x32] sm:$0xff]  ;;  %v3528_v9 = vld [vmem:[#allocation2 + $0x16a] sm:$0xff] }
 0x225   :  { %5910 = vmatprep.subr.msk.bf16.mxu1 %vm6132_vm2, %v7221_v25  ;;  %v3503_v25 = vld [vmem:[#allocation2 + $0x3a] sm:$0xff]  ;;  %v3529_v10 = vld [vmem:[#allocation2 + $0x172] sm:$0xff] }
 0x226   :  { %v5929_v55 = vpack.c.bf16 %v3503_v25, %v3502_v58  ;;  %v5956_v58 = vpack.c.bf16 %v3529_v10, %v3528_v9 }
 0x22b   :  { %5865 = vmatpush3.bf16.xpose.msk.msra.mxu0 %vm6132_vm2, %v7235_v47  ;;  %v3534_v47 = vld [vmem:[#allocation2 + $0x1e2] sm:$0xff] }
 0x22c   :  { %5913 = vmatpush3.bf16.xpose.msk.msra.mxu1 %vm6132_vm2, %v7237_v48  ;;  %5868 = vmatprep.subr.msk.bf16.mxu0 %vm6132_vm2, %v7239_v52  ;;  %v3535_v48 = vld [vmem:[#allocation2 + $0x1ea] sm:$0xff] }
 0x22d   :  { %5916 = vmatprep.subr.msk.bf16.mxu1 %vm6132_vm2, %v7241_v37  ;;  %v3520_v52 = vld [vmem:[#allocation2 + $0x10a] sm:$0xff]  ;;  %v3521_v37 = vld [vmem:[#allocation2 + $0x112] sm:$0xff]  ;;  %v5977_v18 = vpack.c.bf16 %v3535_v48, %v3534_v47 }
 0x22e   :  { %v5932_v19 = vpack.c.bf16 %v3521_v37, %v3520_v52  ;;  %v3512_v47 = vld [vmem:[#allocation2 + $0xaa] sm:$0xff]  ;;  %v3513_v48 = vld [vmem:[#allocation2 + $0xb2] sm:$0xff]  ;;  %v3544_v52 = vld [vmem:[#allocation2 + $0x25a] sm:$0xff] }
 0x22f   :  { %v3545_v37 = vld [vmem:[#allocation2 + $0x262] sm:$0xff] }
 0x233   :  { %5871 = vmatpush3.bf16.xpose.msk.msra.mxu0 %vm6132_vm2, %v7255_v33  ;;  %v3552_v33 = vld [vmem:[#allocation2 + $0x2ba] sm:$0xff] }
 0x234   :  { %5919 = vmatpush3.bf16.xpose.msk.msra.mxu1 %vm6132_vm2, %v7257_v34  ;;  %5874 = vmatprep.subr.msk.bf16.mxu0 %vm6132_vm2, %v5872_v21  ;;  %v3553_v34 = vld [vmem:[#allocation2 + $0x2c2] sm:$0xff] }
 0x235   :  { %5922 = vmatprep.subr.msk.bf16.mxu1 %vm6132_vm2, %v5920_v22  ;;  %v5980_v20 = vpack.c.bf16 %v3553_v34, %v3552_v33  ;;  %v5995_v22 = vpack.c.bf16 %v3541_v2, %v3540_v54  ;;  %v5959_v33 = vpack.c.bf16 %v3513_v48, %v3512_v47  ;;  %v6007_v34 = vpack.c.bf16 %v3545_v37, %v3544_v52 }
 0x23b   :  { %5877 = vmatpush3.bf16.xpose.msk.msra.mxu0 %vm6132_vm2, %v5875_v11  ;;  %v3560_v11 = vld [vmem:[#allocation2 + $0x31a] sm:$0xff] }
 0x23c   :  { %5925 = vmatpush3.bf16.xpose.msk.msra.mxu1 %vm6132_vm2, %v5923_v12  ;;  %5928 = vmatprep.subr.msk.bf16.mxu0 %vm6132_vm2, %v5926_v28  ;;  %v3561_v12 = vld [vmem:[#allocation2 + $0x322] sm:$0xff]  ;;  %v5953_v28 = vpack.c.bf16 %v3511_v5, %v3510_v3 }
 0x23d   :  { %5976 = vmatprep.subr.msk.bf16.mxu1 %vm6132_vm2, %v5974_v57  ;;  %v6001_v57 = vpack.c.bf16 %v3543_v27, %v3542_v13  ;;  %v6004_v25 = vpack.c.bf16 %v3561_v12, %v3560_v11 }
 0x242   :  { %5055 = vmatmul.mubr.msk.f32.vlgmr.msra.gmra.mrb[0].mxu0 %vm15_vm0, %v7472_v17 }
 0x243   :  { %5089 = vmatmul.mubr.msk.f32.vlgmr.msra.gmra.mrb[0].mxu1 %vm15_vm0, %v7472_v17  ;;  %5931 = vmatpush3.bf16.xpose.msk.msra.mxu0 %vm6132_vm2, %v5929_v55  ;;  %v3509_v17 = vld [vmem:[#allocation2 + $0x82] sm:$0xff]  ;;  %v3532_v55 = vld [vmem:[#allocation2 + $0x19a] sm:$0xff] }
 0x244   :  { %5979 = vmatpush3.bf16.xpose.msk.msra.mxu1 %vm6132_vm2, %v5977_v18  ;;  %5934 = vmatprep.subr.msk.bf16.mxu0 %vm6132_vm2, %v5932_v19  ;;  %v5947_v21 = vpack.c.bf16 %v3509_v17, %v3508_v30  ;;  %v3533_v18 = vld [vmem:[#allocation2 + $0x1a2] sm:$0xff]  ;;  %v3564_v19 = vld [vmem:[#allocation2 + $0x34a] sm:$0xff] }
 0x245   :  { %5982 = vmatprep.subr.msk.bf16.mxu1 %vm6132_vm2, %v5980_v20  ;;  %5122 = vmatprep.mubr.msk.f32.mxu0 %vm15_vm0, %v7578_v6  ;;  %v3565_v20 = vld [vmem:[#allocation2 + $0x352] sm:$0xff]  ;;  %v5968_v7 = vpack.c.bf16 %v3533_v18, %v3532_v55 }
 0x246   :  { %5156 = vmatprep.mubr.msk.f32.mxu1 %vm15_vm0, %v7578_v6  ;;  %v6016_v45 = vpack.c.bf16 %v3565_v20, %v3564_v19 }
 0x24b   :  { %5937 = vmatpush3.bf16.xpose.msk.msra.mxu0 %vm6132_vm2, %v5935_v61 }
 0x24c   :  { %5985 = vmatpush3.bf16.xpose.msk.msra.mxu1 %vm6132_vm2, %v5983_v56  ;;  %5940 = vmatprep.subr.msk.bf16.mxu0 %vm6132_vm2, %v5938_v8 }
 0x24d   :  { %5988 = vmatprep.subr.msk.bf16.mxu1 %vm6132_vm2, %v5986_v14 }
 0x253   :  { %5943 = vmatpush3.bf16.xpose.msk.msra.mxu0 %vm6132_vm2, %v5941_v63 }
 0x254   :  { %5991 = vmatpush3.bf16.xpose.msk.msra.mxu1 %vm6132_vm2, %v5989_v1  ;;  %5946 = vmatprep.subr.msk.bf16.mxu0 %vm6132_vm2, %v5944_v51 }
 0x255   :  { %5994 = vmatprep.subr.msk.bf16.mxu1 %vm6132_vm2, %v5992_v29 }
 0x25b   :  { %5949 = vmatpush3.bf16.xpose.msk.msra.mxu0 %vm6132_vm2, %v5947_v21 }
 0x25c   :  { %5997 = vmatpush3.bf16.xpose.msk.msra.mxu1 %vm6132_vm2, %v5995_v22  ;;  %5952 = vmatprep.subr.msk.bf16.mxu0 %vm6132_vm2, %v5950_v23 }
 0x25d   :  { %6000 = vmatprep.subr.msk.bf16.mxu1 %vm6132_vm2, %v5998_v24 }
 0x263   :  { %5955 = vmatpush3.bf16.xpose.msk.msra.mxu0 %vm6132_vm2, %v5953_v28 }
 0x264   :  { %6003 = vmatpush3.bf16.xpose.msk.msra.mxu1 %vm6132_vm2, %v6001_v57  ;;  %5958 = vmatprep.subr.msk.bf16.mxu0 %vm6132_vm2, %v5956_v58 }
 0x265   :  { %6006 = vmatprep.subr.msk.bf16.mxu1 %vm6132_vm2, %v6004_v25 }
 0x26b   :  { %5961 = vmatpush3.bf16.xpose.msk.msra.mxu0 %vm6132_vm2, %v5959_v33 }
 0x26c   :  { %6009 = vmatpush3.bf16.xpose.msk.msra.mxu1 %vm6132_vm2, %v6007_v34  ;;  %5964 = vmatprep.subr.msk.bf16.mxu0 %vm6132_vm2, %v7356_v31  ;;  %v3516_v31 = vld [vmem:[#allocation2 + $0xda] sm:$0xff] }
 0x26d   :  { %6012 = vmatprep.subr.msk.bf16.mxu1 %vm6132_vm2, %v7358_v32  ;;  %v3548_v32 = vld [vmem:[#allocation2 + $0x28a] sm:$0xff]  ;;  %v5971_v36 = vpack.c.bf16 %v3517_v46, %v3516_v31 }
 0x26e   :  { %v6019_v49 = vpack.c.bf16 %v3549_v38, %v3548_v32 }
 0x273   :  { %5967 = vmatpush3.bf16.xpose.msk.msra.mxu0 %vm6132_vm2, %v7372_v41 }
 0x274   :  { %6015 = vmatpush3.bf16.xpose.msk.msra.mxu1 %vm6132_vm2, %v7374_v42  ;;  %5970 = vmatprep.subr.msk.bf16.mxu0 %vm6132_vm2, %v5968_v7 }
 0x275   :  { %6018 = vmatprep.subr.msk.bf16.mxu1 %vm6132_vm2, %v6016_v45 }
 0x27b   :  { %5973 = vmatpush3.bf16.xpose.msk.msra.mxu0 %vm6132_vm2, %v5971_v36 }
 0x27c   :  { %6021 = vmatpush3.bf16.xpose.msk.msra.mxu1 %vm6132_vm2, %v6019_v49 }
 0x27e   :  { %v3913_v41 = vpop.permute.xlu0 %3912 }
 0x282   :  { %5123 = vmatmul.mubr.msk.f32.vlgmr.msra.gmra.mrb[0].mxu0 %vm15_vm0, %v7578_v6 }
 0x283   :  { %5157 = vmatmul.mubr.msk.f32.vlgmr.msra.gmra.mrb[0].mxu1 %vm15_vm0, %v7578_v6 }
 0x355   :  { %v3829_v42 = vpop.f32.mrb[0].mxu0 }
 0x356   :  { %v3915_v50 = vadd.f32 %v3913_v41, %v3829_v42  ;;  %v3900_v60 = vpop.f32.mrb[0].mxu1  ;;  %v3831_v61 = vpop.f32.mrb[1].mxu0 }
 0x357   :  { %v3917_v56 = vadd.f32 %v3913_v41, %v3900_v60  ;;  %v3916_v8 = vadd.f32 %v3913_v41, %v3831_v61  ;;  %v3902_v14 = vpop.f32.mrb[1].mxu1 }
 0x358   :  { %v3919_v15 = vmax.f32 %v3915_v50, 0.0  ;;  %v3918_v16 = vadd.f32 %v3913_v41, %v3902_v14 }
 0x359   :  { %v3921_v4 = vmax.f32 %v3917_v56, 0.0  ;;  %v3920_v39 = vmax.f32 %v3916_v8, 0.0 }
 0x35a   :  { %3923 = vst [vmem:[#allocation3] sm:$0xff] %v3919_v15  ;;  %v3922_v35 = vmax.f32 %v3918_v16, 0.0 }
 0x35b   :  { %3926 = vst [vmem:[#allocation3 + $0x10] sm:$0xff] %v3921_v4  ;;  %3924 = vst [vmem:[#allocation3 + $0x8] sm:$0xff] %v3920_v39 }
 0x35c   :  { %3927 = vst [vmem:[#allocation3 + $0x18] sm:$0xff] %v3922_v35 }
 0x35d   :  { %6071 = shalt.err (!%p6068_p4)
}
 0x35e   :  { %s6072_s27 = scalar_lea.hbm %s7669_s3, 512 }
 0x35f   :  { %p6073_p5 = scmp.ne.s32.totalorder %s7669_s3, %s6072_s27  ;;  %p6076_p6 = scmp.lt.u32.totalorder %s6072_s27, %s7669_s3 }
 0x361   :  { %p6078_p7 = pnand %p6076_p6, %p6073_p5 }
 0x363   :  { %6081 = shalt.err (!%p6078_p7)
}
 0x364   :  { %s6087_s5 = smov 256   ;;  %s6088_s6 = smov 16  }
 0x365   :  { %3939 = dma.vmem_to_hbm [thread:$0]  %s3934_s23, 512, %s7669_s3, [#allocation4], %s6087_s5, %s6087_s5, %s6088_s6  }
 0x366   :  { %6082 = dma.done.wait [#allocation4], 512  }
 0x367   :  { %6083 = vsyncadd [#allocation4], 4294966784 }
 0x368   :  { %3943 = vsyncpa [#allocation4], 1 }

</bundles_post_ra>
